<compile_context>
chip_gen: v6e
topology: v6e:2x2x1
jax: 0.10.0
libtpu: 0.0.40
codegen_flags: <defaults>
</compile_context>

<pallas_src>
import numpy as np
import jax
import jax.numpy as jnp
from jax.experimental import pallas as pl
from jax.experimental.pallas import tpu as pltpu

_GELU_K0 = 0.7978845608028654  # sqrt(2/pi)
_GELU_K1 = 0.044715


def _round_up(x, m):
    return (x + m - 1) // m * m


def _cdiv(a, b):
    return (a + b - 1) // b


def _gelu(x):
    # tanh-approx GELU: the transcendental lands on the (otherwise idle) EUP
    # slot instead of a 5-term erf polynomial on the VALU.  |err| < ~5e-4,
    # well inside the 1e-2 test tolerance.
    return 0.5 * x * (1.0 + jnp.tanh(_GELU_K0 * (x + _GELU_K1 * x * x * x)))


def _default_pack():
    """Samples packed per lane-row: 4 on 128-wide-MXU chips (<= v5),
    8 on 256-wide MXUs (v6e / v7x)."""
    try:
        kind = jax.devices()[0].device_kind.lower()
    except Exception:
        return 8
    return 4 if any(v in kind for v in ("v2", "v3", "v4", "v5")) else 8


def _multilinear_vf_kernel(obs_ref, outc_ref, int_ref, w_ref, b_ref, seg_ref,
                           v_ref):
    """One batch tile (packed rows) of the full MultilinearVF forward.

    obs/outc/int refs: (TBp, P) bf16, P = pack * F, `pack` samples per row
    w_ref:             (8, P, P) bf16 block-diagonal packed weights, resident
    b_ref:             (8, 1, P) f32 tiled biases, resident
    seg_ref:           (P, 128) f32 segment-sum matrix (col j sums sample j)
    v_ref:             (TBp, pack) f32 per-sample outputs
    Weight slot order: phi0, phi1, psi0, psi1, t0, t1, matrix_a, matrix_b.
    """

    def linear(x, k):
        y = jnp.dot(x.astype(jnp.bfloat16), w_ref[k],
                    preferred_element_type=jnp.float32)
        return y + b_ref[k]

    def mlp(x, k0):
        # NormalMLP quirk: GELU after *every* Linear (including the last).
        for j in range(2):
            x = _gelu(linear(x, k0 + j))
        return x

    phi = mlp(obs_ref[...], 0)       # phi_net(obs)
    psi = mlp(outc_ref[...], 2)      # psi_net(outcomes)   (shared weights,
    z = mlp(int_ref[...], 2)         # psi_net(intents)     no concat/split)
    tz = mlp(z, 4)                   # T_net(z)

    phi_z = linear(tz * phi, 6)      # matrix_a (no activation)
    psi_z = linear(tz * psi, 7)      # matrix_b (no activation)

    # Per-sample reduction: sum each F-wide lane segment via a tiny resident
    # ones-matrix matmul (N=128, lane-aligned), then slice the `pack` real
    # columns.  Avoids the relayout a reshape back to (B, F) would force.
    sums = jnp.dot(phi_z * psi_z, seg_ref[...],
                   preferred_element_type=jnp.float32)      # (TBp, 128)
    v_ref[...] = sums[:, :v_ref.shape[1]]


def pack_params(params, input_dim, hidden_dims, pack=None):
    """Pack the 16 (W.T, b) tensors into block-diagonal slabs.

    Each per-sample weight is zero-padded to (F, F) and replicated `pack`
    times on the diagonal of a (pack*F, pack*F) block; biases are tiled along
    lanes.  Zero padding is exact: padded input columns are 0, padded weight
    rows/cols are 0, GELU(0)=0, so padded lanes stay 0 through every layer and
    the block-diagonal structure keeps samples independent.
    """
    if pack is None:
        pack = _default_pack()
    (phi_w0, phi_b0, phi_w1, phi_b1,
     psi_w0, psi_b0, psi_w1, psi_b1,
     t_w0, t_b0, t_w1, t_b1,
     a_w, a_b, b_w, b_b) = params
    ws = [phi_w0, phi_w1, psi_w0, psi_w1, t_w0, t_w1, a_w, b_w]
    bs = [phi_b0, phi_b1, psi_b0, psi_b1, t_b0, t_b1, a_b, b_b]

    feat = _round_up(max([input_dim] + list(hidden_dims)), 8)   # per-sample F
    p = pack * feat                                             # packed width
    w_slab = np.zeros((len(ws), p, p), np.float32)
    b_slab = np.zeros((len(bs), 1, p), np.float32)
    for k, (w, b) in enumerate(zip(ws, bs)):
        w = np.asarray(w, np.float32)
        b = np.asarray(b, np.float32)
        fi, fo = w.shape
        wp = np.zeros((feat, feat), np.float32)
        wp[:fi, :fo] = w
        bp = np.zeros((1, feat), np.float32)
        bp[:, :fo] = b
        for j in range(pack):
            w_slab[k, j * feat:(j + 1) * feat, j * feat:(j + 1) * feat] = wp
            b_slab[k, :, j * feat:(j + 1) * feat] = bp

    # Segment-sum matrix: column j is the indicator of sample j's lanes.
    seg = np.zeros((p, 128), np.float32)
    for j in range(pack):
        seg[j * feat:(j + 1) * feat, j] = 1.0

    return (jnp.asarray(w_slab, jnp.bfloat16),
            jnp.asarray(b_slab, jnp.float32),
            jnp.asarray(seg, jnp.float32),
            feat, pack)


def multilinear_vf_forward(observations, outcomes, intents, packed,
                           max_tile_rows=512):
    w_slab, b_slab, seg, feat, pack = packed
    batch = observations.shape[0]
    p = w_slab.shape[1]

    # Divisor-aware batch tiling over *packed* rows, rounded to 16 rows
    # (bf16 native sublane tile).  At max_tile_rows=512 and P=256 the
    # double-buffered inputs + f32 intermediates are a few MiB -- far under
    # every generation's VMEM limit.  Produce >=2 tiles once the batch is big
    # enough so v7x's second TensorCore gets work.
    bp_rows = max(1, _cdiv(batch, pack))
    n_tiles = max(1, _cdiv(bp_rows, max_tile_rows))
    if bp_rows >= 32 and n_tiles < 2:
        n_tiles = 2
    tile_bp = _round_up(_cdiv(bp_rows, n_tiles), 16)
    n_tiles = max(1, _cdiv(bp_rows, tile_bp))
    bp_pad = n_tiles * tile_bp

    def prep(x):
        b, d = x.shape
        x = x.astype(jnp.bfloat16)                      # cast before pad: half the pad bytes
        x = jnp.pad(x, ((0, bp_pad * pack - b), (0, feat - d)))
        return x.reshape(bp_pad, p)                     # free row-major sample packing

    obs, outc, ints = prep(observations), prep(outcomes), prep(intents)

    row_spec = pl.BlockSpec((tile_bp, p), lambda i: (i, 0))
    w_spec = pl.BlockSpec(w_slab.shape, lambda i: (0, 0, 0))   # constant idx -> resident
    b_spec = pl.BlockSpec(b_slab.shape, lambda i: (0, 0, 0))
    seg_spec = pl.BlockSpec(seg.shape, lambda i: (0, 0))
    out_spec = pl.BlockSpec((tile_bp, pack), lambda i: (i, 0))

    flops = 2 * bp_pad * (10 * p * p + p * 128)          # 10 big matmuls + seg-sum
    transcendentals = 8 * bp_pad * p                      # one tanh per GELU element
    bytes_accessed = (3 * bp_pad * p * 2                  # bf16 inputs
                      + w_slab.size * 2 + b_slab.size * 4 + seg.size * 4
                      + bp_pad * pack * 4)

    v = pl.pallas_call(
        _multilinear_vf_kernel,
        out_shape=jax.ShapeDtypeStruct((bp_pad, pack), jnp.float32),
        grid_spec=pltpu.PrefetchScalarGridSpec(
            num_scalar_prefetch=0,
            grid=(n_tiles,),
            in_specs=[row_spec, row_spec, row_spec, w_spec, b_spec, seg_spec],
            out_specs=out_spec,
        ),
        compiler_params=pltpu.CompilerParams(
            dimension_semantics=("parallel",)),
        cost_estimate=pl.CostEstimate(
            flops=int(flops),
            transcendentals=int(transcendentals),
            bytes_accessed=int(bytes_accessed)),
    )(obs, outc, ints, w_slab, b_slab, seg)

    # (bp_pad, pack) row-major == original sample order.
    return v.reshape(-1)[:batch]


# ----------------------------------------------------------------------------
# Host-side parameter construction + pure-JAX reference (exact erf GELU, f32).
# ----------------------------------------------------------------------------

def _init_linear(key, fan_in, fan_out):
    kw, kb = jax.random.split(key)
    bound = 1.0 / np.sqrt(fan_in)
    w = jax.random.uniform(kw, (fan_in, fan_out), jnp.float32, -bound, bound)  # (in, out) = W.T
    b = jax.random.uniform(kb, (1, fan_out), jnp.float32, -bound, bound)
    return w, b


def make_params(key, input_dim, hidden_dims):
    assert len(hidden_dims) == 2, "kernel is specialised for 2 hidden layers"
    dims = [input_dim] + list(hidden_dims)
    t_dims = [hidden_dims[-1]] + list(hidden_dims)
    keys = jax.random.split(key, 8)
    params = []
    params += _init_linear(keys[0], dims[0], dims[1]) + _init_linear(keys[1], dims[1], dims[2])          # phi_net
    params += _init_linear(keys[2], dims[0], dims[1]) + _init_linear(keys[3], dims[1], dims[2])          # psi_net
    params += _init_linear(keys[4], t_dims[0], t_dims[1]) + _init_linear(keys[5], t_dims[1], t_dims[2])  # T_net
    params += _init_linear(keys[6], dims[-1], dims[-1])  # matrix_a
    params += _init_linear(keys[7], dims[-1], dims[-1])  # matrix_b
    return tuple(params)


def reference_forward(observations, outcomes, intents, params):
    (phi_w0, phi_b0, phi_w1, phi_b1,
     psi_w0, psi_b0, psi_w1, psi_b1,
     t_w0, t_b0, t_w1, t_b1,
     a_w, a_b, b_w, b_b) = params
    gelu = lambda x: jax.nn.gelu(x, approximate=False)

    def mlp(x, layers):
        for w, b in layers:
            x = gelu(x @ w + b)
        return x

    phi = mlp(observations, [(phi_w0, phi_b0), (phi_w1, phi_b1)])
    psi = mlp(outcomes, [(psi_w0, psi_b0), (psi_w1, psi_b1)])
    z = mlp(intents, [(psi_w0, psi_b0), (psi_w1, psi_b1)])
    tz = mlp(z, [(t_w0, t_b0), (t_w1, t_b1)])
    phi_z = (tz * phi) @ a_w + a_b
    psi_z = (tz * psi) @ b_w + b_b
    return jnp.sum(phi_z * psi_z, axis=-1)


if __name__ == "__main__":
    batch, input_dim = 8, 16
    hidden_dims = (32, 32)

    root = jax.random.PRNGKey(0)
    k_obs, k_out, k_int, k_par = jax.random.split(root, 4)
    observations = jax.random.normal(k_obs, (batch, input_dim), jnp.float32)
    outcomes = jax.random.normal(k_out, (batch, input_dim), jnp.float32)
    intents = jax.random.normal(k_int, (batch, input_dim), jnp.float32)
    params = make_params(k_par, input_dim, hidden_dims)
    packed = pack_params(params, input_dim, hidden_dims)

    v = multilinear_vf_forward(observations, outcomes, intents, packed)
    v = jax.block_until_ready(v)

    v_ref = jax.block_until_ready(
        reference_forward(observations, outcomes, intents, params))
    assert v.shape == (batch,)
    assert np.allclose(np.asarray(v), np.asarray(v_ref), rtol=1e-2, atol=1e-2), (
        f"mismatch: {np.max(np.abs(np.asarray(v) - np.asarray(v_ref)))}")

    print("KERNEL_OK")
</pallas_src>

<mosaic_0001>
module attributes {stable_mosaic.version = 11 : i64} {
  func.func @_multilinear_vf_kernel(%arg0: i32, %arg1: memref<16x256xbf16, #tpu.memory_space<vmem>>, %arg2: memref<16x256xbf16, #tpu.memory_space<vmem>>, %arg3: memref<16x256xbf16, #tpu.memory_space<vmem>>, %arg4: memref<8x256x256xbf16, #tpu.memory_space<vmem>>, %arg5: memref<8x1x256xf32, #tpu.memory_space<vmem>>, %arg6: memref<256x128xf32, #tpu.memory_space<vmem>>, %arg7: memref<16x8xf32, #tpu.memory_space<vmem>>) attributes {dimension_semantics = [#tpu.dimension_semantics<parallel>], iteration_bounds = array<i64: 1>, scalar_prefetch = 0 : i64, scratch_operands = 0 : i64, tpu.core_type = #tpu.core_type<tc>, window_params = [{transform_indices = @transform_0, window_bounds = array<i64: 16, 256>}, {transform_indices = @transform_1, window_bounds = array<i64: 16, 256>}, {transform_indices = @transform_2, window_bounds = array<i64: 16, 256>}, {pipeline_mode = #tpu.pipeline_mode<synchronous>, transform_indices = @transform_3, window_bounds = array<i64: 8, 256, 256>}, {pipeline_mode = #tpu.pipeline_mode<synchronous>, transform_indices = @transform_4, window_bounds = array<i64: 8, 1, 256>}, {pipeline_mode = #tpu.pipeline_mode<synchronous>, transform_indices = @transform_5, window_bounds = array<i64: 256, 128>}, {transform_indices = @transform_6, window_bounds = array<i64: 16, 8>}]} {
    %c0 = arith.constant 0 : index
    %c0_0 = arith.constant 0 : index
    %0 = vector.load %arg1[%c0, %c0_0] : memref<16x256xbf16, #tpu.memory_space<vmem>>, vector<16x256xbf16>
    %c0_1 = arith.constant 0 : index
    %c0_2 = arith.constant 0 : index
    %c0_3 = arith.constant 0 : index
    %1 = vector.load %arg4[%c0_1, %c0_2, %c0_3] : memref<8x256x256xbf16, #tpu.memory_space<vmem>>, vector<1x256x256xbf16>
    %2 = vector.shape_cast %1 : vector<1x256x256xbf16> to vector<256x256xbf16>
    %cst = arith.constant dense<0.000000e+00> : vector<16x256xf32>
    %3 = tpu.matmul %0, %2, %cst {dimension_numbers = #tpu.dot_dimension_numbers<[1], [0], [0], [1], [0, 0, 1, 1], [], []>} : vector<16x256xbf16>, vector<256x256xbf16>, vector<16x256xf32> -> vector<16x256xf32>
    %c0_4 = arith.constant 0 : index
    %c0_5 = arith.constant 0 : index
    %c0_6 = arith.constant 0 : index
    %4 = vector.load %arg5[%c0_4, %c0_5, %c0_6] : memref<8x1x256xf32, #tpu.memory_space<vmem>>, vector<1x1x256xf32>
    %5 = vector.shape_cast %4 : vector<1x1x256xf32> to vector<1x256xf32>
    %6 = vector.broadcast %5 : vector<1x256xf32> to vector<16x256xf32>
    %7 = arith.addf %3, %6 : vector<16x256xf32>
    %cst_7 = arith.constant 5.000000e-01 : f32
    %8 = vector.broadcast %cst_7 : f32 to vector<16x256xf32>
    %9 = arith.mulf %8, %7 : vector<16x256xf32>
    %cst_8 = arith.constant 4.471500e-02 : f32
    %10 = vector.broadcast %cst_8 : f32 to vector<16x256xf32>
    %11 = arith.mulf %10, %7 : vector<16x256xf32>
    %12 = arith.mulf %11, %7 : vector<16x256xf32>
    %13 = arith.mulf %12, %7 : vector<16x256xf32>
    %14 = arith.addf %7, %13 : vector<16x256xf32>
    %cst_9 = arith.constant 0.797884583 : f32
    %15 = vector.broadcast %cst_9 : f32 to vector<16x256xf32>
    %16 = arith.mulf %15, %14 : vector<16x256xf32>
    %17 = math.tanh %16 : vector<16x256xf32>
    %cst_10 = arith.constant 1.000000e+00 : f32
    %18 = vector.broadcast %cst_10 : f32 to vector<16x256xf32>
    %19 = arith.addf %18, %17 : vector<16x256xf32>
    %20 = arith.mulf %9, %19 : vector<16x256xf32>
    %21 = arith.truncf %20 : vector<16x256xf32> to vector<16x256xbf16>
    %c1 = arith.constant 1 : index
    %c0_11 = arith.constant 0 : index
    %c0_12 = arith.constant 0 : index
    %22 = vector.load %arg4[%c1, %c0_11, %c0_12] : memref<8x256x256xbf16, #tpu.memory_space<vmem>>, vector<1x256x256xbf16>
    %23 = vector.shape_cast %22 : vector<1x256x256xbf16> to vector<256x256xbf16>
    %cst_13 = arith.constant dense<0.000000e+00> : vector<16x256xf32>
    %24 = tpu.matmul %21, %23, %cst_13 {dimension_numbers = #tpu.dot_dimension_numbers<[1], [0], [0], [1], [0, 0, 1, 1], [], []>} : vector<16x256xbf16>, vector<256x256xbf16>, vector<16x256xf32> -> vector<16x256xf32>
    %c1_14 = arith.constant 1 : index
    %c0_15 = arith.constant 0 : index
    %c0_16 = arith.constant 0 : index
    %25 = vector.load %arg5[%c1_14, %c0_15, %c0_16] : memref<8x1x256xf32, #tpu.memory_space<vmem>>, vector<1x1x256xf32>
    %26 = vector.shape_cast %25 : vector<1x1x256xf32> to vector<1x256xf32>
    %27 = vector.broadcast %26 : vector<1x256xf32> to vector<16x256xf32>
    %28 = arith.addf %24, %27 : vector<16x256xf32>
    %cst_17 = arith.constant 5.000000e-01 : f32
    %29 = vector.broadcast %cst_17 : f32 to vector<16x256xf32>
    %30 = arith.mulf %29, %28 : vector<16x256xf32>
    %cst_18 = arith.constant 4.471500e-02 : f32
    %31 = vector.broadcast %cst_18 : f32 to vector<16x256xf32>
    %32 = arith.mulf %31, %28 : vector<16x256xf32>
    %33 = arith.mulf %32, %28 : vector<16x256xf32>
    %34 = arith.mulf %33, %28 : vector<16x256xf32>
    %35 = arith.addf %28, %34 : vector<16x256xf32>
    %cst_19 = arith.constant 0.797884583 : f32
    %36 = vector.broadcast %cst_19 : f32 to vector<16x256xf32>
    %37 = arith.mulf %36, %35 : vector<16x256xf32>
    %38 = math.tanh %37 : vector<16x256xf32>
    %cst_20 = arith.constant 1.000000e+00 : f32
    %39 = vector.broadcast %cst_20 : f32 to vector<16x256xf32>
    %40 = arith.addf %39, %38 : vector<16x256xf32>
    %41 = arith.mulf %30, %40 : vector<16x256xf32>
    %c0_21 = arith.constant 0 : index
    %c0_22 = arith.constant 0 : index
    %42 = vector.load %arg2[%c0_21, %c0_22] : memref<16x256xbf16, #tpu.memory_space<vmem>>, vector<16x256xbf16>
    %c2 = arith.constant 2 : index
    %c0_23 = arith.constant 0 : index
    %c0_24 = arith.constant 0 : index
    %43 = vector.load %arg4[%c2, %c0_23, %c0_24] : memref<8x256x256xbf16, #tpu.memory_space<vmem>>, vector<1x256x256xbf16>
    %44 = vector.shape_cast %43 : vector<1x256x256xbf16> to vector<256x256xbf16>
    %cst_25 = arith.constant dense<0.000000e+00> : vector<16x256xf32>
    %45 = tpu.matmul %42, %44, %cst_25 {dimension_numbers = #tpu.dot_dimension_numbers<[1], [0], [0], [1], [0, 0, 1, 1], [], []>} : vector<16x256xbf16>, vector<256x256xbf16>, vector<16x256xf32> -> vector<16x256xf32>
    %c2_26 = arith.constant 2 : index
    %c0_27 = arith.constant 0 : index
    %c0_28 = arith.constant 0 : index
    %46 = vector.load %arg5[%c2_26, %c0_27, %c0_28] : memref<8x1x256xf32, #tpu.memory_space<vmem>>, vector<1x1x256xf32>
    %47 = vector.shape_cast %46 : vector<1x1x256xf32> to vector<1x256xf32>
    %48 = vector.broadcast %47 : vector<1x256xf32> to vector<16x256xf32>
    %49 = arith.addf %45, %48 : vector<16x256xf32>
    %cst_29 = arith.constant 5.000000e-01 : f32
    %50 = vector.broadcast %cst_29 : f32 to vector<16x256xf32>
    %51 = arith.mulf %50, %49 : vector<16x256xf32>
    %cst_30 = arith.constant 4.471500e-02 : f32
    %52 = vector.broadcast %cst_30 : f32 to vector<16x256xf32>
    %53 = arith.mulf %52, %49 : vector<16x256xf32>
    %54 = arith.mulf %53, %49 : vector<16x256xf32>
    %55 = arith.mulf %54, %49 : vector<16x256xf32>
    %56 = arith.addf %49, %55 : vector<16x256xf32>
    %cst_31 = arith.constant 0.797884583 : f32
    %57 = vector.broadcast %cst_31 : f32 to vector<16x256xf32>
    %58 = arith.mulf %57, %56 : vector<16x256xf32>
    %59 = math.tanh %58 : vector<16x256xf32>
    %cst_32 = arith.constant 1.000000e+00 : f32
    %60 = vector.broadcast %cst_32 : f32 to vector<16x256xf32>
    %61 = arith.addf %60, %59 : vector<16x256xf32>
    %62 = arith.mulf %51, %61 : vector<16x256xf32>
    %63 = arith.truncf %62 : vector<16x256xf32> to vector<16x256xbf16>
    %c3 = arith.constant 3 : index
    %c0_33 = arith.constant 0 : index
    %c0_34 = arith.constant 0 : index
    %64 = vector.load %arg4[%c3, %c0_33, %c0_34] : memref<8x256x256xbf16, #tpu.memory_space<vmem>>, vector<1x256x256xbf16>
    %65 = vector.shape_cast %64 : vector<1x256x256xbf16> to vector<256x256xbf16>
    %cst_35 = arith.constant dense<0.000000e+00> : vector<16x256xf32>
    %66 = tpu.matmul %63, %65, %cst_35 {dimension_numbers = #tpu.dot_dimension_numbers<[1], [0], [0], [1], [0, 0, 1, 1], [], []>} : vector<16x256xbf16>, vector<256x256xbf16>, vector<16x256xf32> -> vector<16x256xf32>
    %c3_36 = arith.constant 3 : index
    %c0_37 = arith.constant 0 : index
    %c0_38 = arith.constant 0 : index
    %67 = vector.load %arg5[%c3_36, %c0_37, %c0_38] : memref<8x1x256xf32, #tpu.memory_space<vmem>>, vector<1x1x256xf32>
    %68 = vector.shape_cast %67 : vector<1x1x256xf32> to vector<1x256xf32>
    %69 = vector.broadcast %68 : vector<1x256xf32> to vector<16x256xf32>
    %70 = arith.addf %66, %69 : vector<16x256xf32>
    %cst_39 = arith.constant 5.000000e-01 : f32
    %71 = vector.broadcast %cst_39 : f32 to vector<16x256xf32>
    %72 = arith.mulf %71, %70 : vector<16x256xf32>
    %cst_40 = arith.constant 4.471500e-02 : f32
    %73 = vector.broadcast %cst_40 : f32 to vector<16x256xf32>
    %74 = arith.mulf %73, %70 : vector<16x256xf32>
    %75 = arith.mulf %74, %70 : vector<16x256xf32>
    %76 = arith.mulf %75, %70 : vector<16x256xf32>
    %77 = arith.addf %70, %76 : vector<16x256xf32>
    %cst_41 = arith.constant 0.797884583 : f32
    %78 = vector.broadcast %cst_41 : f32 to vector<16x256xf32>
    %79 = arith.mulf %78, %77 : vector<16x256xf32>
    %80 = math.tanh %79 : vector<16x256xf32>
    %cst_42 = arith.constant 1.000000e+00 : f32
    %81 = vector.broadcast %cst_42 : f32 to vector<16x256xf32>
    %82 = arith.addf %81, %80 : vector<16x256xf32>
    %83 = arith.mulf %72, %82 : vector<16x256xf32>
    %c0_43 = arith.constant 0 : index
    %c0_44 = arith.constant 0 : index
    %84 = vector.load %arg3[%c0_43, %c0_44] : memref<16x256xbf16, #tpu.memory_space<vmem>>, vector<16x256xbf16>
    %c2_45 = arith.constant 2 : index
    %c0_46 = arith.constant 0 : index
    %c0_47 = arith.constant 0 : index
    %85 = vector.load %arg4[%c2_45, %c0_46, %c0_47] : memref<8x256x256xbf16, #tpu.memory_space<vmem>>, vector<1x256x256xbf16>
    %86 = vector.shape_cast %85 : vector<1x256x256xbf16> to vector<256x256xbf16>
    %cst_48 = arith.constant dense<0.000000e+00> : vector<16x256xf32>
    %87 = tpu.matmul %84, %86, %cst_48 {dimension_numbers = #tpu.dot_dimension_numbers<[1], [0], [0], [1], [0, 0, 1, 1], [], []>} : vector<16x256xbf16>, vector<256x256xbf16>, vector<16x256xf32> -> vector<16x256xf32>
    %c2_49 = arith.constant 2 : index
    %c0_50 = arith.constant 0 : index
    %c0_51 = arith.constant 0 : index
    %88 = vector.load %arg5[%c2_49, %c0_50, %c0_51] : memref<8x1x256xf32, #tpu.memory_space<vmem>>, vector<1x1x256xf32>
    %89 = vector.shape_cast %88 : vector<1x1x256xf32> to vector<1x256xf32>
    %90 = vector.broadcast %89 : vector<1x256xf32> to vector<16x256xf32>
    %91 = arith.addf %87, %90 : vector<16x256xf32>
    %cst_52 = arith.constant 5.000000e-01 : f32
    %92 = vector.broadcast %cst_52 : f32 to vector<16x256xf32>
    %93 = arith.mulf %92, %91 : vector<16x256xf32>
    %cst_53 = arith.constant 4.471500e-02 : f32
    %94 = vector.broadcast %cst_53 : f32 to vector<16x256xf32>
    %95 = arith.mulf %94, %91 : vector<16x256xf32>
    %96 = arith.mulf %95, %91 : vector<16x256xf32>
    %97 = arith.mulf %96, %91 : vector<16x256xf32>
    %98 = arith.addf %91, %97 : vector<16x256xf32>
    %cst_54 = arith.constant 0.797884583 : f32
    %99 = vector.broadcast %cst_54 : f32 to vector<16x256xf32>
    %100 = arith.mulf %99, %98 : vector<16x256xf32>
    %101 = math.tanh %100 : vector<16x256xf32>
    %cst_55 = arith.constant 1.000000e+00 : f32
    %102 = vector.broadcast %cst_55 : f32 to vector<16x256xf32>
    %103 = arith.addf %102, %101 : vector<16x256xf32>
    %104 = arith.mulf %93, %103 : vector<16x256xf32>
    %105 = arith.truncf %104 : vector<16x256xf32> to vector<16x256xbf16>
    %c3_56 = arith.constant 3 : index
    %c0_57 = arith.constant 0 : index
    %c0_58 = arith.constant 0 : index
    %106 = vector.load %arg4[%c3_56, %c0_57, %c0_58] : memref<8x256x256xbf16, #tpu.memory_space<vmem>>, vector<1x256x256xbf16>
    %107 = vector.shape_cast %106 : vector<1x256x256xbf16> to vector<256x256xbf16>
    %cst_59 = arith.constant dense<0.000000e+00> : vector<16x256xf32>
    %108 = tpu.matmul %105, %107, %cst_59 {dimension_numbers = #tpu.dot_dimension_numbers<[1], [0], [0], [1], [0, 0, 1, 1], [], []>} : vector<16x256xbf16>, vector<256x256xbf16>, vector<16x256xf32> -> vector<16x256xf32>
    %c3_60 = arith.constant 3 : index
    %c0_61 = arith.constant 0 : index
    %c0_62 = arith.constant 0 : index
    %109 = vector.load %arg5[%c3_60, %c0_61, %c0_62] : memref<8x1x256xf32, #tpu.memory_space<vmem>>, vector<1x1x256xf32>
    %110 = vector.shape_cast %109 : vector<1x1x256xf32> to vector<1x256xf32>
    %111 = vector.broadcast %110 : vector<1x256xf32> to vector<16x256xf32>
    %112 = arith.addf %108, %111 : vector<16x256xf32>
    %cst_63 = arith.constant 5.000000e-01 : f32
    %113 = vector.broadcast %cst_63 : f32 to vector<16x256xf32>
    %114 = arith.mulf %113, %112 : vector<16x256xf32>
    %cst_64 = arith.constant 4.471500e-02 : f32
    %115 = vector.broadcast %cst_64 : f32 to vector<16x256xf32>
    %116 = arith.mulf %115, %112 : vector<16x256xf32>
    %117 = arith.mulf %116, %112 : vector<16x256xf32>
    %118 = arith.mulf %117, %112 : vector<16x256xf32>
    %119 = arith.addf %112, %118 : vector<16x256xf32>
    %cst_65 = arith.constant 0.797884583 : f32
    %120 = vector.broadcast %cst_65 : f32 to vector<16x256xf32>
    %121 = arith.mulf %120, %119 : vector<16x256xf32>
    %122 = math.tanh %121 : vector<16x256xf32>
    %cst_66 = arith.constant 1.000000e+00 : f32
    %123 = vector.broadcast %cst_66 : f32 to vector<16x256xf32>
    %124 = arith.addf %123, %122 : vector<16x256xf32>
    %125 = arith.mulf %114, %124 : vector<16x256xf32>
    %126 = arith.truncf %125 : vector<16x256xf32> to vector<16x256xbf16>
    %c4 = arith.constant 4 : index
    %c0_67 = arith.constant 0 : index
    %c0_68 = arith.constant 0 : index
    %127 = vector.load %arg4[%c4, %c0_67, %c0_68] : memref<8x256x256xbf16, #tpu.memory_space<vmem>>, vector<1x256x256xbf16>
    %128 = vector.shape_cast %127 : vector<1x256x256xbf16> to vector<256x256xbf16>
    %cst_69 = arith.constant dense<0.000000e+00> : vector<16x256xf32>
    %129 = tpu.matmul %126, %128, %cst_69 {dimension_numbers = #tpu.dot_dimension_numbers<[1], [0], [0], [1], [0, 0, 1, 1], [], []>} : vector<16x256xbf16>, vector<256x256xbf16>, vector<16x256xf32> -> vector<16x256xf32>
    %c4_70 = arith.constant 4 : index
    %c0_71 = arith.constant 0 : index
    %c0_72 = arith.constant 0 : index
    %130 = vector.load %arg5[%c4_70, %c0_71, %c0_72] : memref<8x1x256xf32, #tpu.memory_space<vmem>>, vector<1x1x256xf32>
    %131 = vector.shape_cast %130 : vector<1x1x256xf32> to vector<1x256xf32>
    %132 = vector.broadcast %131 : vector<1x256xf32> to vector<16x256xf32>
    %133 = arith.addf %129, %132 : vector<16x256xf32>
    %cst_73 = arith.constant 5.000000e-01 : f32
    %134 = vector.broadcast %cst_73 : f32 to vector<16x256xf32>
    %135 = arith.mulf %134, %133 : vector<16x256xf32>
    %cst_74 = arith.constant 4.471500e-02 : f32
    %136 = vector.broadcast %cst_74 : f32 to vector<16x256xf32>
    %137 = arith.mulf %136, %133 : vector<16x256xf32>
    %138 = arith.mulf %137, %133 : vector<16x256xf32>
    %139 = arith.mulf %138, %133 : vector<16x256xf32>
    %140 = arith.addf %133, %139 : vector<16x256xf32>
    %cst_75 = arith.constant 0.797884583 : f32
    %141 = vector.broadcast %cst_75 : f32 to vector<16x256xf32>
    %142 = arith.mulf %141, %140 : vector<16x256xf32>
    %143 = math.tanh %142 : vector<16x256xf32>
    %cst_76 = arith.constant 1.000000e+00 : f32
    %144 = vector.broadcast %cst_76 : f32 to vector<16x256xf32>
    %145 = arith.addf %144, %143 : vector<16x256xf32>
    %146 = arith.mulf %135, %145 : vector<16x256xf32>
    %147 = arith.truncf %146 : vector<16x256xf32> to vector<16x256xbf16>
    %c5 = arith.constant 5 : index
    %c0_77 = arith.constant 0 : index
    %c0_78 = arith.constant 0 : index
    %148 = vector.load %arg4[%c5, %c0_77, %c0_78] : memref<8x256x256xbf16, #tpu.memory_space<vmem>>, vector<1x256x256xbf16>
    %149 = vector.shape_cast %148 : vector<1x256x256xbf16> to vector<256x256xbf16>
    %cst_79 = arith.constant dense<0.000000e+00> : vector<16x256xf32>
    %150 = tpu.matmul %147, %149, %cst_79 {dimension_numbers = #tpu.dot_dimension_numbers<[1], [0], [0], [1], [0, 0, 1, 1], [], []>} : vector<16x256xbf16>, vector<256x256xbf16>, vector<16x256xf32> -> vector<16x256xf32>
    %c5_80 = arith.constant 5 : index
    %c0_81 = arith.constant 0 : index
    %c0_82 = arith.constant 0 : index
    %151 = vector.load %arg5[%c5_80, %c0_81, %c0_82] : memref<8x1x256xf32, #tpu.memory_space<vmem>>, vector<1x1x256xf32>
    %152 = vector.shape_cast %151 : vector<1x1x256xf32> to vector<1x256xf32>
    %153 = vector.broadcast %152 : vector<1x256xf32> to vector<16x256xf32>
    %154 = arith.addf %150, %153 : vector<16x256xf32>
    %cst_83 = arith.constant 5.000000e-01 : f32
    %155 = vector.broadcast %cst_83 : f32 to vector<16x256xf32>
    %156 = arith.mulf %155, %154 : vector<16x256xf32>
    %cst_84 = arith.constant 4.471500e-02 : f32
    %157 = vector.broadcast %cst_84 : f32 to vector<16x256xf32>
    %158 = arith.mulf %157, %154 : vector<16x256xf32>
    %159 = arith.mulf %158, %154 : vector<16x256xf32>
    %160 = arith.mulf %159, %154 : vector<16x256xf32>
    %161 = arith.addf %154, %160 : vector<16x256xf32>
    %cst_85 = arith.constant 0.797884583 : f32
    %162 = vector.broadcast %cst_85 : f32 to vector<16x256xf32>
    %163 = arith.mulf %162, %161 : vector<16x256xf32>
    %164 = math.tanh %163 : vector<16x256xf32>
    %cst_86 = arith.constant 1.000000e+00 : f32
    %165 = vector.broadcast %cst_86 : f32 to vector<16x256xf32>
    %166 = arith.addf %165, %164 : vector<16x256xf32>
    %167 = arith.mulf %156, %166 : vector<16x256xf32>
    %168 = arith.mulf %167, %41 : vector<16x256xf32>
    %169 = arith.truncf %168 : vector<16x256xf32> to vector<16x256xbf16>
    %c6 = arith.constant 6 : index
    %c0_87 = arith.constant 0 : index
    %c0_88 = arith.constant 0 : index
    %170 = vector.load %arg4[%c6, %c0_87, %c0_88] : memref<8x256x256xbf16, #tpu.memory_space<vmem>>, vector<1x256x256xbf16>
    %171 = vector.shape_cast %170 : vector<1x256x256xbf16> to vector<256x256xbf16>
    %cst_89 = arith.constant dense<0.000000e+00> : vector<16x256xf32>
    %172 = tpu.matmul %169, %171, %cst_89 {dimension_numbers = #tpu.dot_dimension_numbers<[1], [0], [0], [1], [0, 0, 1, 1], [], []>} : vector<16x256xbf16>, vector<256x256xbf16>, vector<16x256xf32> -> vector<16x256xf32>
    %c6_90 = arith.constant 6 : index
    %c0_91 = arith.constant 0 : index
    %c0_92 = arith.constant 0 : index
    %173 = vector.load %arg5[%c6_90, %c0_91, %c0_92] : memref<8x1x256xf32, #tpu.memory_space<vmem>>, vector<1x1x256xf32>
    %174 = vector.shape_cast %173 : vector<1x1x256xf32> to vector<1x256xf32>
    %175 = vector.broadcast %174 : vector<1x256xf32> to vector<16x256xf32>
    %176 = arith.addf %172, %175 : vector<16x256xf32>
    %177 = arith.mulf %167, %83 : vector<16x256xf32>
    %178 = arith.truncf %177 : vector<16x256xf32> to vector<16x256xbf16>
    %c7 = arith.constant 7 : index
    %c0_93 = arith.constant 0 : index
    %c0_94 = arith.constant 0 : index
    %179 = vector.load %arg4[%c7, %c0_93, %c0_94] : memref<8x256x256xbf16, #tpu.memory_space<vmem>>, vector<1x256x256xbf16>
    %180 = vector.shape_cast %179 : vector<1x256x256xbf16> to vector<256x256xbf16>
    %cst_95 = arith.constant dense<0.000000e+00> : vector<16x256xf32>
    %181 = tpu.matmul %178, %180, %cst_95 {dimension_numbers = #tpu.dot_dimension_numbers<[1], [0], [0], [1], [0, 0, 1, 1], [], []>} : vector<16x256xbf16>, vector<256x256xbf16>, vector<16x256xf32> -> vector<16x256xf32>
    %c7_96 = arith.constant 7 : index
    %c0_97 = arith.constant 0 : index
    %c0_98 = arith.constant 0 : index
    %182 = vector.load %arg5[%c7_96, %c0_97, %c0_98] : memref<8x1x256xf32, #tpu.memory_space<vmem>>, vector<1x1x256xf32>
    %183 = vector.shape_cast %182 : vector<1x1x256xf32> to vector<1x256xf32>
    %184 = vector.broadcast %183 : vector<1x256xf32> to vector<16x256xf32>
    %185 = arith.addf %181, %184 : vector<16x256xf32>
    %186 = arith.mulf %176, %185 : vector<16x256xf32>
    %c0_99 = arith.constant 0 : index
    %c0_100 = arith.constant 0 : index
    %187 = vector.load %arg6[%c0_99, %c0_100] : memref<256x128xf32, #tpu.memory_space<vmem>>, vector<256x128xf32>
    %cst_101 = arith.constant dense<0.000000e+00> : vector<16x128xf32>
    %188 = tpu.matmul %186, %187, %cst_101 {dimension_numbers = #tpu.dot_dimension_numbers<[1], [0], [0], [1], [0, 0, 1, 1], [], []>} : vector<16x256xf32>, vector<256x128xf32>, vector<16x128xf32> -> vector<16x128xf32>
    %189 = vector.extract_strided_slice %188 {offsets = [0, 0], sizes = [16, 8], strides = [1, 1]} : vector<16x128xf32> to vector<16x8xf32>
    %c0_102 = arith.constant 0 : index
    %c0_103 = arith.constant 0 : index
    %190 = vector.load %arg7[%c0_102, %c0_103] : memref<16x8xf32, #tpu.memory_space<vmem>>, vector<16x8xf32>
    tpu.vector_store %arg7[%c0_102, %c0_103], %189 {strides = array<i32>} : memref<16x8xf32, #tpu.memory_space<vmem>>, vector<16x8xf32>,
    return
  }
  func.func @transform_0(%arg0: i32) -> (i32, i32) {
    %c0_i32 = arith.constant 0 : i32
    %c0_i32_0 = arith.constant 0 : i32
    return %arg0, %c0_i32 : i32, i32
  }
  func.func @transform_1(%arg0: i32) -> (i32, i32) {
    %c0_i32 = arith.constant 0 : i32
    %c0_i32_0 = arith.constant 0 : i32
    return %arg0, %c0_i32 : i32, i32
  }
  func.func @transform_2(%arg0: i32) -> (i32, i32) {
    %c0_i32 = arith.constant 0 : i32
    %c0_i32_0 = arith.constant 0 : i32
    return %arg0, %c0_i32 : i32, i32
  }
  func.func @transform_3(%arg0: i32) -> (i32, i32, i32) {
    %c0_i32 = arith.constant 0 : i32
    %c0_i32_0 = arith.constant 0 : i32
    %c0_i32_1 = arith.constant 0 : i32
    %c0_i32_2 = arith.constant 0 : i32
    return %c0_i32, %c0_i32_0, %c0_i32_1 : i32, i32, i32
  }
  func.func @transform_4(%arg0: i32) -> (i32, i32, i32) {
    %c0_i32 = arith.constant 0 : i32
    %c0_i32_0 = arith.constant 0 : i32
    %c0_i32_1 = arith.constant 0 : i32
    %c0_i32_2 = arith.constant 0 : i32
    return %c0_i32, %c0_i32_0, %c0_i32_1 : i32, i32, i32
  }
  func.func @transform_5(%arg0: i32) -> (i32, i32) {
    %c0_i32 = arith.constant 0 : i32
    %c0_i32_0 = arith.constant 0 : i32
    %c0_i32_1 = arith.constant 0 : i32
    return %c0_i32, %c0_i32_0 : i32, i32
  }
  func.func @transform_6(%arg0: i32) -> (i32, i32) {
    %c0_i32 = arith.constant 0 : i32
    %c0_i32_0 = arith.constant 0 : i32
    return %arg0, %c0_i32 : i32, i32
  }
}

</mosaic_0001>

<bundles_post_ra>
// kernel: tpu_custom_call.1
= control target key start
LH: loop header
LB: loop body
LE: loop exit
PB: predicated region body
PF: predicated region fallthrough
CT: control target
= control target key end

     0   :  { %11 = vsyncpa [#allocation3], 0  ;;  %s4082_s0 = inlined_call_operand.hbm [shape: bf16[16,256], index: 0, kind: input, shape index: {}]   ;;  %s4083_s1 = inlined_call_operand.hbm [shape: bf16[16,256], index: 1, kind: input, shape index: {}]   ;;  %s4084_s2 = inlined_call_operand.hbm [shape: bf16[16,256], index: 2, kind: input, shape index: {}]   ;;  %s4085_s3 = inlined_call_operand.hbm [shape: bf16[8,256,256], index: 3, kind: input, shape index: {}]   ;;  %s4086_s4 = inlined_call_operand.hbm [shape: f32[8,1,256], index: 4, kind: input, shape index: {}]   ;;  %s4087_s5 = inlined_call_operand.hbm [shape: f32[256,128], index: 5, kind: input, shape index: {}]   ;;  %s4088_s6 = inlined_call_operand.vmem [shape: f32[16,8], index: 6, kind: output, shape index: {}]  }
   0x1   :  { %12 = vsyncpa [#allocation5], 0 }
   0x2   :  { %13 = vsyncpa [#allocation8], 0 }
   0x3   :  { %14 = vsyncpa [#allocation11], 0  ;;  %s3576_s21 = smov [#allocation4]   ;;  %s3577_s23 = smov [#allocation7]  }
   0x4   :  { %s32_s22 = sshll.u32 %s3576_s21, 4  ;;  %s56_s24 = sshll.u32 %s3577_s23, 4  ;;  %s33_s22 = int_to_ptr.vmem [resolvable:$true] %s32_s22  ;;  %s57_s24 = int_to_ptr.vmem [resolvable:$true] %s56_s24 }
   0x5   :  { %s3456_s25 = scalar_lea.vmem %s33_s22, 256  ;;  %p3461_p1 = scmp.lt.s32.totalorder %s33_s22, %s33_s22 }
   0x6   :  { %p3457_p0 = scmp.ne.s32.totalorder %s33_s22, %s3456_s25  ;;  %p3462_p2 = scmp.lt.s32.totalorder %s3456_s25, %s3456_s25 }
   0x8   :  { %p3463_p3 = por %p3462_p2, %p3461_p1 }
   0xa   :  { %p3464_p4 = pnand %p3463_p3, %p3457_p0 }
   0xc   :  { %3467 = shalt.err (!%p3464_p4)
}
   0xd   :  { %s3578_s26 = smov 128   ;;  %s3579_s27 = smov 8  }
   0xe   :  { %38 = dma.hbm_to_vmem [thread:$0]  %s4083_s1, 256, %s33_s22, [#allocation5], %s3578_s26, %s3578_s26, %s3579_s27  }
   0xf   :  { %s3476_s30 = scalar_lea.vmem %s57_s24, 32768  ;;  %p3481_p6 = scmp.lt.s32.totalorder %s57_s24, %s57_s24 }
  0x10   :  { %p3477_p5 = scmp.ne.s32.totalorder %s57_s24, %s3476_s30  ;;  %p3482_p7 = scmp.lt.s32.totalorder %s3476_s30, %s3476_s30 }
  0x12   :  { %p3483_p8 = por %p3482_p7, %p3481_p6 }
  0x14   :  { %p3484_p9 = pnand %p3483_p8, %p3477_p5 }
  0x16   :  { %3487 = shalt.err (!%p3484_p9)
}
  0x17   :  { %62 = dma.hbm_to_vmem [thread:$0]  %s4085_s3, 32768, %s57_s24, [#allocation8], %s3578_s26, %s3578_s26, %s3579_s27  }
  0x18   :  { %s3580_s9 = smov [#allocation2]   ;;  %s3581_s11 = smov [#allocation6]  }
  0x19   :  { %s20_s10 = sshll.u32 %s3580_s9, 4  ;;  %s44_s12 = sshll.u32 %s3581_s11, 4  ;;  %s21_s10 = int_to_ptr.vmem [resolvable:$true] %s20_s10  ;;  %s45_s12 = int_to_ptr.vmem [resolvable:$true] %s44_s12 }
  0x1a   :  { %s3496_s1 = scalar_lea.vmem %s21_s10, 256  ;;  %p3501_p11 = scmp.lt.s32.totalorder %s21_s10, %s21_s10 }
  0x1b   :  { %p3497_p10 = scmp.ne.s32.totalorder %s21_s10, %s3496_s1  ;;  %p3502_p12 = scmp.lt.s32.totalorder %s3496_s1, %s3496_s1 }
  0x1d   :  { %p3503_p13 = por %p3502_p12, %p3501_p11 }
  0x1f   :  { %p3504_p0 = pnand %p3503_p13, %p3497_p10 }
  0x21   :  { %3507 = shalt.err (!%p3504_p0)
}
  0x22   :  { %26 = dma.hbm_to_vmem [thread:$0]  %s4082_s0, 256, %s21_s10, [#allocation3], %s3578_s26, %s3578_s26, %s3579_s27  }
  0x23   :  { %s3516_s3 = scalar_lea.vmem %s45_s12, 256  ;;  %p3521_p2 = scmp.lt.s32.totalorder %s45_s12, %s45_s12 }
  0x24   :  { %p3517_p1 = scmp.ne.s32.totalorder %s45_s12, %s3516_s3  ;;  %p3522_p3 = scmp.lt.s32.totalorder %s3516_s3, %s3516_s3 }
  0x26   :  { %p3523_p4 = por %p3522_p3, %p3521_p2 }
  0x28   :  { %p3524_p5 = pnand %p3523_p4, %p3517_p1 }
  0x2a   :  { %3527 = shalt.err (!%p3524_p5)
}
  0x2b   :  { %50 = dma.hbm_to_vmem [thread:$0]  %s4084_s2, 256, %s45_s12, [#allocation5], %s3578_s26, %s3578_s26, %s3579_s27  }
  0x2c   :  { %s3582_s17 = smov [#allocation9]  }
  0x2d   :  { %s68_s18 = sshll.u32 %s3582_s17, 4  ;;  %s69_s18 = int_to_ptr.vmem [resolvable:$true] %s68_s18 }
  0x2e   :  { %s3536_s19 = scalar_lea.vmem %s69_s18, 256  ;;  %p3541_p7 = scmp.lt.s32.totalorder %s69_s18, %s69_s18 }
  0x2f   :  { %p3537_p6 = scmp.ne.s32.totalorder %s69_s18, %s3536_s19  ;;  %p3542_p8 = scmp.lt.s32.totalorder %s3536_s19, %s3536_s19 }
  0x31   :  { %p3543_p9 = por %p3542_p8, %p3541_p7 }
  0x33   :  { %p3544_p10 = pnand %p3543_p9, %p3537_p6 }
  0x35   :  { %3547 = shalt.err (!%p3544_p10)
}
  0x36   :  { %s3583_s0 = smov 32   ;;  %s3584_s20 = smov 2  }
  0x37   :  { %74 = dma.hbm_to_vmem [thread:$0]  %s4086_s4, 256, %s69_s18, [#allocation8], %s3583_s0, %s3583_s0, %s3584_s20  }
  0x38   :  { %s3585_s23 = smov [#allocation10]  }
  0x39   :  { %s80_s24 = sshll.u32 %s3585_s23, 4  ;;  %s81_s24 = int_to_ptr.vmem [resolvable:$true] %s80_s24 }
  0x3a   :  { %s3556_s2 = scalar_lea.vmem %s81_s24, 4096  ;;  %p3561_p12 = scmp.lt.s32.totalorder %s81_s24, %s81_s24 }
  0x3b   :  { %p3557_p11 = scmp.ne.s32.totalorder %s81_s24, %s3556_s2  ;;  %p3562_p13 = scmp.lt.s32.totalorder %s3556_s2, %s3556_s2 }
  0x3d   :  { %p3563_p0 = por %p3562_p13, %p3561_p12 }
  0x3f   :  { %p3564_p1 = pnand %p3563_p0, %p3557_p11 }
  0x41   :  { %3567 = shalt.err (!%p3564_p1)
}
  0x42   :  { %86 = dma.hbm_to_vmem [thread:$0]  %s4087_s5, 4096, %s81_s24, [#allocation11], %s3578_s26, %s3578_s26, %s3579_s27  }
  0x43   :  { %3568 = dma.done.wait [#allocation3], 256  }
  0x44   :  { %3569 = vsyncadd [#allocation3], 4294967040 }
  0x45   :  { %3570 = dma.done.wait [#allocation5], 512  }
  0x46   :  { %3571 = vsyncadd [#allocation5], 4294966784 }
  0x47   :  { %3572 = dma.done.wait [#allocation8], 33024  }
  0x48   :  { %3573 = vsyncadd [#allocation8], 4294934272 }
  0x49   :  { %3574 = dma.done.wait [#allocation11], 4096  }
  0x4a   :  { %3575 = vsyncadd [#allocation11], 4294963200  ;;  %v2991_v0 = vld [vmem:[#allocation7 + $0x74] ss:$8 sps:$4 sm:$0xff]   ;;  %v2993_v1 = vld [vmem:[#allocation7 + $0x70] ss:$8 sps:$4 sm:$0xff]  }
  0x4b   :  { %321 = vmatprep.subr.bf16.mxu0 %v2991_v0  ;;  %v2994_v2 = vld [vmem:[#allocation7 + $0x64] ss:$8 sps:$4 sm:$0xff]   ;;  %v2996_v3 = vld [vmem:[#allocation7 + $0x60] ss:$8 sps:$4 sm:$0xff]   ;;  %v2997_v4 = vld [vmem:[#allocation7 + $0x54] ss:$8 sps:$4 sm:$0xff]  }
  0x4c   :  { %322 = vmatpush1.bf16.msra.mxu0 %v2993_v1  ;;  %v2999_v5 = vld [vmem:[#allocation7 + $0x50] ss:$8 sps:$4 sm:$0xff]   ;;  %v3000_v6 = vld [vmem:[#allocation7 + $0x44] ss:$8 sps:$4 sm:$0xff]   ;;  %v3002_v7 = vld [vmem:[#allocation7 + $0x40] ss:$8 sps:$4 sm:$0xff]  }
  0x4d   :  { %323 = vmatprep.subr.bf16.mxu0 %v2994_v2  ;;  %v3003_v8 = vld [vmem:[#allocation7 + $0x34] ss:$8 sps:$4 sm:$0xff]   ;;  %v3005_v9 = vld [vmem:[#allocation7 + $0x30] ss:$8 sps:$4 sm:$0xff]   ;;  %v3006_v10 = vld [vmem:[#allocation7 + $0x24] ss:$8 sps:$4 sm:$0xff]  }
  0x4e   :  { %v3008_v11 = vld [vmem:[#allocation7 + $0x20] ss:$8 sps:$4 sm:$0xff]   ;;  %v3009_v12 = vld [vmem:[#allocation7 + $0x14] ss:$8 sps:$4 sm:$0xff]   ;;  %v3011_v14 = vld [vmem:[#allocation7 + $0x10] ss:$8 sps:$4 sm:$0xff]  }
  0x4f   :  { %v3041_v13 = vld [vmem:[#allocation2 + $0x4] ss:$8 sps:$4 sm:$0xff]   ;;  %v3012_v15 = vld [vmem:[#allocation7 + $0x4] ss:$8 sps:$4 sm:$0xff]   ;;  %v3014_v16 = vld [vmem:[#allocation7] ss:$8 sps:$4 sm:$0xff]  }
  0x50   :  { %324 = vmatpush1.bf16.msra.mxu0 %v2996_v3  ;;  %353 = vmatprep.mubr.bf16.mxu0 %v3041_v13  ;;  %v3015_v17 = vld [vmem:[#allocation7 + $0xf4] ss:$8 sps:$4 sm:$0xff]   ;;  %v3017_v18 = vld [vmem:[#allocation7 + $0xf0] ss:$8 sps:$4 sm:$0xff]   ;;  %v3018_v19 = vld [vmem:[#allocation7 + $0xe4] ss:$8 sps:$4 sm:$0xff]  }
  0x51   :  { %325 = vmatprep.subr.bf16.mxu0 %v2997_v4  ;;  %v3020_v20 = vld [vmem:[#allocation7 + $0xe0] ss:$8 sps:$4 sm:$0xff]   ;;  %v3021_v21 = vld [vmem:[#allocation7 + $0xd4] ss:$8 sps:$4 sm:$0xff]   ;;  %v3023_v22 = vld [vmem:[#allocation7 + $0xd0] ss:$8 sps:$4 sm:$0xff]  }
  0x52   :  { %v3024_v23 = vld [vmem:[#allocation7 + $0xc4] ss:$8 sps:$4 sm:$0xff]   ;;  %v3026_v24 = vld [vmem:[#allocation7 + $0xc0] ss:$8 sps:$4 sm:$0xff]   ;;  %v3027_v25 = vld [vmem:[#allocation7 + $0xb4] ss:$8 sps:$4 sm:$0xff]  }
  0x53   :  { %v3029_v26 = vld [vmem:[#allocation7 + $0xb0] ss:$8 sps:$4 sm:$0xff]   ;;  %v3030_v27 = vld [vmem:[#allocation7 + $0xa4] ss:$8 sps:$4 sm:$0xff]   ;;  %v3032_v28 = vld [vmem:[#allocation7 + $0xa0] ss:$8 sps:$4 sm:$0xff]  }
  0x54   :  { %326 = vmatpush1.bf16.msra.mxu0 %v2999_v5  ;;  %v3033_v29 = vld [vmem:[#allocation7 + $0x94] ss:$8 sps:$4 sm:$0xff]   ;;  %v3035_v30 = vld [vmem:[#allocation7 + $0x90] ss:$8 sps:$4 sm:$0xff]   ;;  %v3036_v31 = vld [vmem:[#allocation7 + $0x84] ss:$8 sps:$4 sm:$0xff]  }
  0x55   :  { %327 = vmatprep.subr.bf16.mxu0 %v3000_v6  ;;  %v3038_v32 = vld [vmem:[#allocation7 + $0x80] ss:$8 sps:$4 sm:$0xff]   ;;  %v3654_v33 = vld [vmem:[#allocation7 + $0x274] ss:$8 sps:$4 sm:$0xff]   ;;  %v3039_v34 = vld [vmem:[#allocation2] ss:$8 sps:$4 sm:$0xff]  }
  0x56   :  { %v3656_v35 = vld [vmem:[#allocation7 + $0x270] ss:$8 sps:$4 sm:$0xff]   ;;  %v3658_v36 = vld [vmem:[#allocation7 + $0x264] ss:$8 sps:$4 sm:$0xff]   ;;  %v3096_v38 = vld [vmem:[#allocation7 + $0x174] ss:$8 sps:$4 sm:$0xff]  }
  0x57   :  { %v3092_v37 = vld [vmem:[#allocation4 + $0x4] ss:$8 sps:$4 sm:$0xff]   ;;  %v3098_v39 = vld [vmem:[#allocation7 + $0x170] ss:$8 sps:$4 sm:$0xff]   ;;  %v3662_v41 = vld [vmem:[#allocation7 + $0x260] ss:$8 sps:$4 sm:$0xff]   ;;  %608 = vmatprep.subr.bf16.mxu1 %v3096_v38 }
  0x58   :  { %328 = vmatpush1.bf16.msra.mxu0 %v3002_v7  ;;  %v3099_v40 = vld [vmem:[#allocation7 + $0x164] ss:$8 sps:$4 sm:$0xff]   ;;  %v3665_v42 = vld [vmem:[#allocation7 + $0x254] ss:$8 sps:$4 sm:$0xff]   ;;  %v3667_v43 = vld [vmem:[#allocation7 + $0x250] ss:$8 sps:$4 sm:$0xff]   ;;  %609 = vmatpush1.bf16.msra.mxu1 %v3098_v39  ;;  %v141_v39 = vlaneseq }
  0x59   :  { %329 = vmatprep.subr.bf16.mxu0 %v3003_v8  ;;  %v3101_v44 = vld [vmem:[#allocation7 + $0x160] ss:$8 sps:$4 sm:$0xff]   ;;  %v3669_v45 = vld [vmem:[#allocation7 + $0x244] ss:$8 sps:$4 sm:$0xff]   ;;  %610 = vmatprep.subr.bf16.mxu1 %v3099_v40  ;;  %v3102_v46 = vld [vmem:[#allocation7 + $0x154] ss:$8 sps:$4 sm:$0xff]  }
  0x5a   :  { %v3104_v47 = vld [vmem:[#allocation7 + $0x150] ss:$8 sps:$4 sm:$0xff]   ;;  %v3105_v48 = vld [vmem:[#allocation7 + $0x144] ss:$8 sps:$4 sm:$0xff]   ;;  %v3673_v49 = vld [vmem:[#allocation7 + $0x240] ss:$8 sps:$4 sm:$0xff]  }
  0x5b   :  { %v3675_v50 = vld [vmem:[#allocation7 + $0x234] ss:$8 sps:$4 sm:$0xff]   ;;  %v3107_v51 = vld [vmem:[#allocation7 + $0x140] ss:$8 sps:$4 sm:$0xff]   ;;  %v3679_v53 = vld [vmem:[#allocation7 + $0x230] ss:$8 sps:$4 sm:$0xff]  }
  0x5c   :  { %330 = vmatpush1.bf16.msra.mxu0 %v3005_v9  ;;  %611 = vmatpush1.bf16.msra.mxu1 %v3101_v44  ;;  %v3108_v52 = vld [vmem:[#allocation7 + $0x134] ss:$8 sps:$4 sm:$0xff]   ;;  %v3681_v54 = vld [vmem:[#allocation7 + $0x224] ss:$8 sps:$4 sm:$0xff]   ;;  %v3110_v55 = vld [vmem:[#allocation7 + $0x130] ss:$8 sps:$4 sm:$0xff]  }
  0x5d   :  { %331 = vmatprep.subr.bf16.mxu0 %v3006_v10  ;;  %612 = vmatprep.subr.bf16.mxu1 %v3102_v46  ;;  %v3111_v56 = vld [vmem:[#allocation7 + $0x124] ss:$8 sps:$4 sm:$0xff]   ;;  %v3685_v57 = vld [vmem:[#allocation7 + $0x220] ss:$8 sps:$4 sm:$0xff]   ;;  %v3687_v58 = vld [vmem:[#allocation7 + $0x214] ss:$8 sps:$4 sm:$0xff]  }
  0x5e   :  { %v3113_v59 = vld [vmem:[#allocation7 + $0x120] ss:$8 sps:$4 sm:$0xff]   ;;  %v3691_v60 = vld [vmem:[#allocation7 + $0x210] ss:$8 sps:$4 sm:$0xff]   ;;  %v3693_v61 = vld [vmem:[#allocation7 + $0x204] ss:$8 sps:$4 sm:$0xff]  }
  0x5f   :  { %v3697_v62 = vld [vmem:[#allocation7 + $0x200] ss:$8 sps:$4 sm:$0xff]   ;;  %v3699_v63 = vld [vmem:[#allocation7 + $0x2f4] ss:$8 sps:$4 sm:$0xff]   ;;  %v3703_v0 = vld [vmem:[#allocation7 + $0x2f0] ss:$8 sps:$4 sm:$0xff]  }
  0x60   :  { %332 = vmatpush1.bf16.msra.mxu0 %v3008_v11  ;;  %613 = vmatpush1.bf16.msra.mxu1 %v3104_v47  ;;  %v3705_v1 = vld [vmem:[#allocation7 + $0x2e4] ss:$8 sps:$4 sm:$0xff]   ;;  %v3709_v2 = vld [vmem:[#allocation7 + $0x2e0] ss:$8 sps:$4 sm:$0xff]   ;;  %v3711_v3 = vld [vmem:[#allocation7 + $0x2d4] ss:$8 sps:$4 sm:$0xff]  }
  0x61   :  { %333 = vmatprep.subr.bf16.mxu0 %v3009_v12  ;;  %614 = vmatprep.subr.bf16.mxu1 %v3105_v48  ;;  %v3715_v4 = vld [vmem:[#allocation7 + $0x2d0] ss:$8 sps:$4 sm:$0xff]   ;;  %v3717_v5 = vld [vmem:[#allocation7 + $0x2c4] ss:$8 sps:$4 sm:$0xff]   ;;  %v3721_v6 = vld [vmem:[#allocation7 + $0x2c0] ss:$8 sps:$4 sm:$0xff]  }
  0x62   :  { %v3723_v7 = vld [vmem:[#allocation7 + $0x2b4] ss:$8 sps:$4 sm:$0xff]   ;;  %v3727_v8 = vld [vmem:[#allocation7 + $0x2b0] ss:$8 sps:$4 sm:$0xff]   ;;  %v3729_v9 = vld [vmem:[#allocation7 + $0x2a4] ss:$8 sps:$4 sm:$0xff]  }
  0x63   :  { %v3734_v10 = vld [vmem:[#allocation7 + $0x2a0] ss:$8 sps:$4 sm:$0xff]   ;;  %v3737_v11 = vld [vmem:[#allocation7 + $0x294] ss:$8 sps:$4 sm:$0xff]   ;;  %v3740_v12 = vld [vmem:[#allocation7 + $0x290] ss:$8 sps:$4 sm:$0xff]  }
  0x64   :  { %334 = vmatpush1.bf16.msra.mxu0 %v3011_v14  ;;  %615 = vmatpush1.bf16.msra.mxu1 %v3107_v51  ;;  %v3743_v13 = vld [vmem:[#allocation7 + $0x284] ss:$8 sps:$4 sm:$0xff]   ;;  %v3746_v14 = vld [vmem:[#allocation7 + $0x280] ss:$8 sps:$4 sm:$0xff]   ;;  %v3093_v38 = vld [vmem:[#allocation6] ss:$8 sps:$4 sm:$0xff]  }
  0x65   :  { %335 = vmatprep.subr.bf16.mxu0 %v3012_v15  ;;  %616 = vmatprep.subr.bf16.mxu1 %v3108_v52  ;;  %v3090_v15 = vld [vmem:[#allocation4] ss:$8 sps:$4 sm:$0xff]   ;;  %v142_v40 = vshrl.u32 %v141_v39, 7  ;;  %vm2638_vm0 = vcmask 64512  }
  0x66   :  { %v3820_v39 = vld [vmem:[#allocation7 + $0x320] ss:$8 sps:$4 sm:$0xff]  }
  0x68   :  { %336 = vmatpush1.bf16.msra.mxu0 %v3014_v16  ;;  %617 = vmatpush1.bf16.msra.mxu1 %v3110_v55  ;;  %v3095_v16 = vld [vmem:[#allocation6 + $0x4] ss:$8 sps:$4 sm:$0xff]  }
  0x69   :  { %337 = vmatprep.subr.bf16.mxu0 %v3015_v17  ;;  %618 = vmatprep.subr.bf16.mxu1 %v3111_v56  ;;  %v3114_v17 = vld [vmem:[#allocation7 + $0x114] ss:$8 sps:$4 sm:$0xff]  }
  0x6c   :  { %338 = vmatpush2.bf16.msra.mxu0 %v3017_v18  ;;  %619 = vmatpush1.bf16.msra.mxu1 %v3113_v59  ;;  %v3116_v18 = vld [vmem:[#allocation7 + $0x110] ss:$8 sps:$4 sm:$0xff]  }
  0x6d   :  { %339 = vmatprep.subr.bf16.mxu0 %v3018_v19  ;;  %620 = vmatprep.subr.bf16.mxu1 %v3114_v17  ;;  %v3117_v19 = vld [vmem:[#allocation7 + $0x104] ss:$8 sps:$4 sm:$0xff]  }
  0x70   :  { %340 = vmatpush2.bf16.msra.mxu0 %v3020_v20  ;;  %621 = vmatpush1.bf16.msra.mxu1 %v3116_v18  ;;  %v3119_v20 = vld [vmem:[#allocation7 + $0x100] ss:$8 sps:$4 sm:$0xff]  }
  0x71   :  { %341 = vmatprep.subr.bf16.mxu0 %v3021_v21  ;;  %622 = vmatprep.subr.bf16.mxu1 %v3117_v19  ;;  %v3120_v21 = vld [vmem:[#allocation7 + $0x1f4] ss:$8 sps:$4 sm:$0xff]  }
  0x74   :  { %342 = vmatpush2.bf16.msra.mxu0 %v3023_v22  ;;  %623 = vmatpush1.bf16.msra.mxu1 %v3119_v20  ;;  %v3122_v22 = vld [vmem:[#allocation7 + $0x1f0] ss:$8 sps:$4 sm:$0xff]  }
  0x75   :  { %343 = vmatprep.subr.bf16.mxu0 %v3024_v23  ;;  %624 = vmatprep.subr.bf16.mxu1 %v3120_v21  ;;  %v3123_v23 = vld [vmem:[#allocation7 + $0x1e4] ss:$8 sps:$4 sm:$0xff]  }
  0x78   :  { %344 = vmatpush2.bf16.msra.mxu0 %v3026_v24  ;;  %625 = vmatpush2.bf16.msra.mxu1 %v3122_v22  ;;  %v3125_v24 = vld [vmem:[#allocation7 + $0x1e0] ss:$8 sps:$4 sm:$0xff]  }
  0x79   :  { %345 = vmatprep.subr.bf16.mxu0 %v3027_v25  ;;  %v3126_v25 = vld [vmem:[#allocation7 + $0x1d4] ss:$8 sps:$4 sm:$0xff]   ;;  %626 = vmatprep.subr.bf16.mxu1 %v3123_v23 }
  0x7c   :  { %346 = vmatpush2.bf16.msra.mxu0 %v3029_v26  ;;  %627 = vmatpush2.bf16.msra.mxu1 %v3125_v24  ;;  %v3128_v26 = vld [vmem:[#allocation7 + $0x1d0] ss:$8 sps:$4 sm:$0xff]  }
  0x7d   :  { %347 = vmatprep.subr.bf16.mxu0 %v3030_v27  ;;  %628 = vmatprep.subr.bf16.mxu1 %v3126_v25  ;;  %v3129_v27 = vld [vmem:[#allocation7 + $0x1c4] ss:$8 sps:$4 sm:$0xff]  }
  0x80   :  { %348 = vmatpush2.bf16.msra.mxu0 %v3032_v28  ;;  %629 = vmatpush2.bf16.msra.mxu1 %v3128_v26  ;;  %v3131_v28 = vld [vmem:[#allocation7 + $0x1c0] ss:$8 sps:$4 sm:$0xff]  }
  0x81   :  { %349 = vmatprep.subr.bf16.mxu0 %v3033_v29  ;;  %630 = vmatprep.subr.bf16.mxu1 %v3129_v27  ;;  %v3132_v29 = vld [vmem:[#allocation7 + $0x1b4] ss:$8 sps:$4 sm:$0xff]   ;;  %v3791_v27 = vld [vmem:[#allocation7 + $0x370] ss:$8 sps:$4 sm:$0xff]  }
  0x84   :  { %350 = vmatpush2.bf16.msra.mxu0 %v3035_v30  ;;  %631 = vmatpush2.bf16.msra.mxu1 %v3131_v28  ;;  %v3134_v30 = vld [vmem:[#allocation7 + $0x1b0] ss:$8 sps:$4 sm:$0xff]  }
  0x85   :  { %351 = vmatprep.subr.bf16.mxu0 %v3036_v31  ;;  %632 = vmatprep.subr.bf16.mxu1 %v3132_v29  ;;  %v3135_v31 = vld [vmem:[#allocation7 + $0x1a4] ss:$8 sps:$4 sm:$0xff]  }
  0x86   :  { %v3793_v29 = vld [vmem:[#allocation7 + $0x364] ss:$8 sps:$4 sm:$0xff]  }
  0x88   :  { %352 = vmatpush2.bf16.msra.mxu0 %v3038_v32  ;;  %633 = vmatpush2.bf16.msra.mxu1 %v3134_v30  ;;  %v3137_v32 = vld [vmem:[#allocation7 + $0x1a0] ss:$8 sps:$4 sm:$0xff]  }
  0x89   :  { %905 = vmatprep.subr.bf16.mxu0 %v3654_v33  ;;  %634 = vmatprep.subr.bf16.mxu1 %v3135_v31  ;;  %v3796_v30 = vld [vmem:[#allocation7 + $0x360] ss:$8 sps:$4 sm:$0xff]   ;;  %v3799_v31 = vld [vmem:[#allocation7 + $0x354] ss:$8 sps:$4 sm:$0xff]  }
  0x8b   :  { %354 = vmatmul.mubr.bf16.vlgmr.msra.gmra.mxu0 %v3039_v34  ;;  %v3140_v34 = vld [vmem:[#allocation7 + $0x190] ss:$8 sps:$4 sm:$0xff]  }
  0x8c   :  { %906 = vmatpush1.bf16.msra.mxu0 %v3656_v35  ;;  %937 = vmatprep.mubr.bf16.mxu0 %v3092_v37  ;;  %v3771_v37 = vld [vmem:[#allocation7 + $0x374] ss:$8 sps:$4 sm:$0xff]  }
  0x8d   :  { %907 = vmatprep.subr.bf16.mxu0 %v3658_v36  ;;  %635 = vmatpush2.bf16.msra.mxu1 %v3137_v32  ;;  %v3802_v32 = vld [vmem:[#allocation7 + $0x350] ss:$8 sps:$4 sm:$0xff]  }
  0x90   :  { %908 = vmatpush1.bf16.msra.mxu0 %v3662_v41 }
  0x91   :  { %909 = vmatprep.subr.bf16.mxu0 %v3665_v42 }
  0x94   :  { %910 = vmatpush1.bf16.msra.mxu0 %v3667_v43 }
  0x95   :  { %911 = vmatprep.subr.bf16.mxu0 %v3669_v45 }
  0x98   :  { %912 = vmatpush1.bf16.msra.mxu0 %v3673_v49 }
  0x99   :  { %913 = vmatprep.subr.bf16.mxu0 %v3675_v50 }
  0x9c   :  { %914 = vmatpush1.bf16.msra.mxu0 %v3679_v53 }
  0x9d   :  { %915 = vmatprep.subr.bf16.mxu0 %v3681_v54 }
  0xa0   :  { %916 = vmatpush1.bf16.msra.mxu0 %v3685_v57 }
  0xa1   :  { %917 = vmatprep.subr.bf16.mxu0 %v3687_v58 }
  0xa4   :  { %918 = vmatpush1.bf16.msra.mxu0 %v3691_v60 }
  0xa5   :  { %919 = vmatprep.subr.bf16.mxu0 %v3693_v61 }
  0xa8   :  { %920 = vmatpush1.bf16.msra.mxu0 %v3697_v62 }
  0xa9   :  { %921 = vmatprep.subr.bf16.mxu0 %v3699_v63 }
  0xac   :  { %922 = vmatpush2.bf16.msra.mxu0 %v3703_v0 }
  0xad   :  { %923 = vmatprep.subr.bf16.mxu0 %v3705_v1 }
  0xb0   :  { %924 = vmatpush2.bf16.msra.mxu0 %v3709_v2 }
  0xb1   :  { %925 = vmatprep.subr.bf16.mxu0 %v3711_v3 }
  0xb4   :  { %926 = vmatpush2.bf16.msra.mxu0 %v3715_v4 }
  0xb5   :  { %927 = vmatprep.subr.bf16.mxu0 %v3717_v5 }
  0xb8   :  { %928 = vmatpush2.bf16.msra.mxu0 %v3721_v6 }
  0xb9   :  { %929 = vmatprep.subr.bf16.mxu0 %v3723_v7 }
  0xbc   :  { %930 = vmatpush2.bf16.msra.mxu0 %v3727_v8 }
  0xbd   :  { %931 = vmatprep.subr.bf16.mxu0 %v3729_v9 }
  0xc0   :  { %932 = vmatpush2.bf16.msra.mxu0 %v3734_v10 }
  0xc1   :  { %933 = vmatprep.subr.bf16.mxu0 %v3737_v11 }
  0xc4   :  { %934 = vmatpush2.bf16.msra.mxu0 %v3740_v12 }
  0xc5   :  { %935 = vmatprep.subr.bf16.mxu0 %v3743_v13 }
  0xc8   :  { %936 = vmatpush2.bf16.msra.mxu0 %v3746_v14 }
  0xc9   :  { %1283 = vmatprep.subr.bf16.mxu0 %v3654_v33  ;;  %v3138_v33 = vld [vmem:[#allocation7 + $0x194] ss:$8 sps:$4 sm:$0xff]  }
  0xca   :  { %636 = vmatprep.subr.bf16.mxu1 %v3138_v33  ;;  %v3805_v33 = vld [vmem:[#allocation7 + $0x344] ss:$8 sps:$4 sm:$0xff]  }
  0xcb   :  { %938 = vmatmul.mubr.bf16.vlgmr.msra.gmra.mxu0 %v3090_v15  ;;  %637 = vmatpush2.bf16.msra.mxu1 %v3140_v34  ;;  %v3808_v34 = vld [vmem:[#allocation7 + $0x340] ss:$8 sps:$4 sm:$0xff]  }
  0xcc   :  { %1284 = vmatpush1.bf16.msra.mxu0 %v3656_v35  ;;  %1315 = vmatprep.mubr.bf16.mxu0 %v3095_v16  ;;  %v3141_v35 = vld [vmem:[#allocation7 + $0x184] ss:$8 sps:$4 sm:$0xff]  }
  0xcd   :  { %1285 = vmatprep.subr.bf16.mxu0 %v3658_v36  ;;  %v3143_v36 = vld [vmem:[#allocation7 + $0x180] ss:$8 sps:$4 sm:$0xff]   ;;  %638 = vmatprep.subr.bf16.mxu1 %v3141_v35  ;;  %v3811_v35 = vld [vmem:[#allocation7 + $0x334] ss:$8 sps:$4 sm:$0xff]  }
  0xcf   :  { %639 = vmatpush2.bf16.msra.mxu1 %v3143_v36  ;;  %v3814_v36 = vld [vmem:[#allocation7 + $0x330] ss:$8 sps:$4 sm:$0xff]  }
  0xd0   :  { %1286 = vmatpush1.bf16.msra.mxu0 %v3662_v41  ;;  %1192 = vmatprep.subr.bf16.mxu1 %v3771_v37  ;;  %v3785_v41 = vsub.s32 0, %v142_v40 }
  0xd1   :  { %1287 = vmatprep.subr.bf16.mxu0 %v3665_v42  ;;  %v139_v42 = vld [vmem:[#allocation9] sm:$0x3] }
  0xd2   :  { %v144_v44 = vrot.slane %v139_v42, %v3785_v41 }
  0xd4   :  { %1288 = vmatpush1.bf16.msra.mxu0 %v3667_v43  ;;  %v3787_v43 = vsub.s32 1, %v142_v40  ;;  %v723_v40 = vld [vmem:[#allocation9 + $0x4] sm:$0x3] }
  0xd5   :  { %1289 = vmatprep.subr.bf16.mxu0 %v3669_v45 }
  0xd6   :  { %v148_v45 = vrot.slane %v139_v42, %v3787_v43  ;;  %v3823_v42 = vld [vmem:[#allocation7 + $0x314] ss:$8 sps:$4 sm:$0xff]  }
  0xd8   :  { %1290 = vmatpush1.bf16.msra.mxu0 %v3673_v49 }
  0xd9   :  { %1291 = vmatprep.subr.bf16.mxu0 %v3675_v50 }
  0xdc   :  { %1292 = vmatpush1.bf16.msra.mxu0 %v3679_v53 }
  0xdd   :  { %1293 = vmatprep.subr.bf16.mxu0 %v3681_v54 }
  0xe0   :  { %1294 = vmatpush1.bf16.msra.mxu0 %v3685_v57 }
  0xe1   :  { %1295 = vmatprep.subr.bf16.mxu0 %v3687_v58 }
  0xe4   :  { %1296 = vmatpush1.bf16.msra.mxu0 %v3691_v60 }
  0xe5   :  { %1297 = vmatprep.subr.bf16.mxu0 %v3693_v61 }
  0xe8   :  { %1298 = vmatpush1.bf16.msra.mxu0 %v3697_v62 }
  0xe9   :  { %1299 = vmatprep.subr.bf16.mxu0 %v3699_v63 }
  0xec   :  { %1300 = vmatpush2.bf16.msra.mxu0 %v3703_v0 }
  0xed   :  { %1301 = vmatprep.subr.bf16.mxu0 %v3705_v1 }
  0xf0   :  { %1302 = vmatpush2.bf16.msra.mxu0 %v3709_v2 }
  0xf1   :  { %1303 = vmatprep.subr.bf16.mxu0 %v3711_v3 }
  0xf4   :  { %1304 = vmatpush2.bf16.msra.mxu0 %v3715_v4 }
  0xf5   :  { %1305 = vmatprep.subr.bf16.mxu0 %v3717_v5 }
  0xf8   :  { %1306 = vmatpush2.bf16.msra.mxu0 %v3721_v6 }
  0xf9   :  { %1307 = vmatprep.subr.bf16.mxu0 %v3723_v7 }
  0xfc   :  { %1308 = vmatpush2.bf16.msra.mxu0 %v3727_v8 }
  0xfd   :  { %1309 = vmatprep.subr.bf16.mxu0 %v3729_v9 }
 0x100   :  { %1310 = vmatpush2.bf16.msra.mxu0 %v3734_v10 }
 0x101   :  { %1311 = vmatprep.subr.bf16.mxu0 %v3737_v11 }
 0x104   :  { %1312 = vmatpush2.bf16.msra.mxu0 %v3740_v12 }
 0x105   :  { %1313 = vmatprep.subr.bf16.mxu0 %v3743_v13 }
 0x108   :  { %1314 = vmatpush2.bf16.msra.mxu0 %v3746_v14 }
 0x10b   :  { %1316 = vmatmul.mubr.bf16.vlgmr.msra.gmra.mxu0 %v3093_v38  ;;  %v3817_v38 = vld [vmem:[#allocation7 + $0x324] ss:$8 sps:$4 sm:$0xff]  }
 0x14b   :  { %v355_v46 = vpop.f32.mrf.mxu0 }
 0x14c   :  { %v356_v47 = vadd.f32 %v355_v46, %v144_v44  ;;  %v3832_v46 = vld [vmem:[#allocation7 + $0x304] ss:$8 sps:$4 sm:$0xff]  }
 0x14d   :  { %v357_v48 = vpop.f32.mrf.mxu0 }
 0x14e   :  { %v368_v49 = vmul.f32 0.044715, %v356_v47  ;;  %v358_v50 = vadd.f32 %v357_v48, %v148_v45  ;;  %v364_v21 = vmul.f32 0.5, %v356_v47 }
 0x14f   :  { %v359_v51 = vpop.f32.mrf.mxu0 }
 0x150   :  { %v372_v52 = vmul.f32 %v368_v49, %v356_v47  ;;  %v369_v53 = vmul.f32 0.044715, %v358_v50  ;;  %v360_v54 = vadd.f32 %v359_v51, %v144_v44  ;;  %v365_v18 = vmul.f32 0.5, %v358_v50 }
 0x151   :  { %v361_v55 = vpop.f32.mrf.mxu0  ;;  %v3827_v44 = vrot.slane %v723_v40, %v3785_v41 }
 0x152   :  { %v376_v56 = vmul.f32 %v372_v52, %v356_v47  ;;  %v370_v57 = vmul.f32 0.044715, %v360_v54  ;;  %v362_v58 = vadd.f32 %v361_v55, %v148_v45  ;;  %v373_v59 = vmul.f32 %v369_v53, %v358_v50  ;;  %v3829_v45 = vld [vmem:[#allocation7 + $0x310] ss:$8 sps:$4 sm:$0xff]   ;;  %v3844_v52 = vld [vmem:[#allocation7 + $0x3f4] ss:$8 sps:$4 sm:$0xff]  }
 0x153   :  { %v366_v16 = vmul.f32 0.5, %v360_v54 }
 0x154   :  { %v374_v60 = vmul.f32 %v370_v57, %v360_v54  ;;  %v371_v61 = vmul.f32 0.044715, %v362_v58  ;;  %v377_v62 = vmul.f32 %v373_v59, %v358_v50  ;;  %v380_v63 = vadd.f32 %v376_v56, %v356_v47  ;;  %v3854_v59 = vld [vmem:[#allocation7 + $0x3f0] ss:$8 sps:$4 sm:$0xff]  }
 0x155   :  { %v367_v19 = vmul.f32 0.5, %v362_v58  ;;  %v3835_v47 = vrot.slane %v723_v40, %v3787_v43  ;;  %v3896_v40 = vld [vmem:[#allocation7 + $0x390] ss:$8 sps:$4 sm:$0xff]  }
 0x156   :  { %v378_v0 = vmul.f32 %v374_v60, %v360_v54  ;;  %v375_v1 = vmul.f32 %v371_v61, %v362_v58  ;;  %v381_v2 = vadd.f32 %v377_v62, %v358_v50  ;;  %v384_v3 = vmul.f32 0.7978846, %v380_v63  ;;  %v3841_v50 = vld [vmem:[#allocation7 + $0x300] ss:$8 sps:$4 sm:$0xff]   ;;  %v3857_v61 = vld [vmem:[#allocation7 + $0x3e4] ss:$8 sps:$4 sm:$0xff]  }
 0x158   :  { %v379_v4 = vmul.f32 %v375_v1, %v362_v58  ;;  %v385_v5 = vmul.f32 0.7978846, %v381_v2  ;;  %v382_v6 = vadd.f32 %v378_v0, %v360_v54 }
 0x15a   :  { %v383_v7 = vadd.f32 %v379_v4, %v362_v58  ;;  %3384 = vtanh.f32 %v385_v5  ;;  %v386_v8 = vmul.f32 0.7978846, %v382_v6  ;;  %v3865_v6 = vld [vmem:[#allocation7 + $0x3e0] ss:$8 sps:$4 sm:$0xff]  }
 0x15b   :  { %3386 = vtanh.f32 %v384_v3 }
 0x15c   :  { %v387_v9 = vmul.f32 0.7978846, %v383_v7  ;;  %3388 = vtanh.f32 %v386_v8  ;;  %v3868_v7 = vld [vmem:[#allocation7 + $0x3d4] ss:$8 sps:$4 sm:$0xff]  }
 0x15e   :  { %3390 = vtanh.f32 %v387_v9 }
 0x167   :  { %v3385_v10 = vpop.eup %3384 }
 0x168   :  { %v3387_v11 = vpop.eup %3386  ;;  %v393_v13 = vadd.f32 1.0, %v3385_v10 }
 0x169   :  { %v3389_v12 = vpop.eup %3388  ;;  %v392_v17 = vadd.f32 1.0, %v3387_v11 }
 0x16a   :  { %v394_v14 = vadd.f32 1.0, %v3389_v12  ;;  %v397_v23 = vmul.f32 %v393_v13, %v365_v18 }
 0x16b   :  { %v3391_v15 = vpop.eup %3390  ;;  %v396_v25 = vmul.f32 %v392_v17, %v364_v21  ;;  %v3881_v21 = vld [vmem:[#allocation7 + $0x3b4] ss:$8 sps:$4 sm:$0xff]  }
 0x16c   :  { %v395_v20 = vadd.f32 1.0, %v3391_v15  ;;  %v398_v22 = vmul.f32 %v394_v14, %v366_v16  ;;  %v3872_v14 = vld [vmem:[#allocation7 + $0x3d0] ss:$8 sps:$4 sm:$0xff]   ;;  %v3875_v16 = vld [vmem:[#allocation7 + $0x3c4] ss:$8 sps:$4 sm:$0xff]  }
 0x16e   :  { %v399_v24 = vmul.f32 %v395_v20, %v367_v19  ;;  %v400_v28 = vpack.c.bf16 %v398_v22, %v396_v25  ;;  %v3878_v19 = vld [vmem:[#allocation7 + $0x3c0] ss:$8 sps:$4 sm:$0xff]   ;;  %v3884_v22 = vld [vmem:[#allocation7 + $0x3b0] ss:$8 sps:$4 sm:$0xff]   ;;  %v3893_v25 = vld [vmem:[#allocation7 + $0x394] ss:$8 sps:$4 sm:$0xff]  }
 0x170   :  { %v401_v26 = vpack.c.bf16 %v399_v24, %v397_v23  ;;  %v3887_v23 = vld [vmem:[#allocation7 + $0x3a4] ss:$8 sps:$4 sm:$0xff]   ;;  %v3890_v24 = vld [vmem:[#allocation7 + $0x3a0] ss:$8 sps:$4 sm:$0xff]  }
 0x172   :  { %640 = vmatprep.mubr.bf16.mxu1 %v401_v26 }
 0x173   :  { %641 = vmatmul.mubr.bf16.vlgmr.msra.gmra.mxu1 %v400_v28 }
 0x174   :  { %1193 = vmatpush1.bf16.msra.mxu1 %v3791_v27 }
 0x175   :  { %1194 = vmatprep.subr.bf16.mxu1 %v3793_v29 }
 0x178   :  { %1195 = vmatpush1.bf16.msra.mxu1 %v3796_v30 }
 0x179   :  { %1196 = vmatprep.subr.bf16.mxu1 %v3799_v31 }
 0x17c   :  { %1197 = vmatpush1.bf16.msra.mxu1 %v3802_v32 }
 0x17d   :  { %1198 = vmatprep.subr.bf16.mxu1 %v3805_v33 }
 0x180   :  { %1199 = vmatpush1.bf16.msra.mxu1 %v3808_v34 }
 0x181   :  { %1200 = vmatprep.subr.bf16.mxu1 %v3811_v35 }
 0x184   :  { %1201 = vmatpush1.bf16.msra.mxu1 %v3814_v36 }
 0x185   :  { %1202 = vmatprep.subr.bf16.mxu1 %v3817_v38 }
 0x188   :  { %1203 = vmatpush1.bf16.msra.mxu1 %v3820_v39 }
 0x189   :  { %1204 = vmatprep.subr.bf16.mxu1 %v3823_v42 }
 0x18b   :  { %v939_v48 = vpop.f32.mrf.mxu0 }
 0x18c   :  { %v3838_v49 = vadd.f32 %v939_v48, %v3827_v44  ;;  %1205 = vmatpush1.bf16.msra.mxu1 %v3829_v45 }
 0x18d   :  { %v941_v51 = vpop.f32.mrf.mxu0  ;;  %1206 = vmatprep.subr.bf16.mxu1 %v3832_v46 }
 0x18e   :  { %v952_v53 = vmul.f32 0.044715, %v3838_v49  ;;  %v3848_v54 = vadd.f32 %v941_v51, %v3835_v47  ;;  %v3899_v51 = vld [vmem:[#allocation7 + $0x384] ss:$8 sps:$4 sm:$0xff]  }
 0x18f   :  { %v943_v55 = vpop.f32.mrf.mxu0 }
 0x190   :  { %v956_v56 = vmul.f32 %v952_v53, %v3838_v49  ;;  %v953_v57 = vmul.f32 0.044715, %v3848_v54  ;;  %v944_v58 = vadd.f32 %v943_v55, %v3827_v44  ;;  %1207 = vmatpush1.bf16.msra.mxu1 %v3841_v50 }
 0x191   :  { %v945_v60 = vpop.f32.mrf.mxu0  ;;  %1208 = vmatprep.subr.bf16.mxu1 %v3844_v52 }
 0x192   :  { %v960_v62 = vmul.f32 %v956_v56, %v3838_v49  ;;  %v957_v63 = vmul.f32 %v953_v57, %v3848_v54  ;;  %v954_v0 = vmul.f32 0.044715, %v944_v58  ;;  %v946_v1 = vadd.f32 %v945_v60, %v3835_v47 }
 0x193   :  { %v950_v57 = vmul.f32 0.5, %v944_v58 }
 0x194   :  { %v964_v2 = vadd.f32 %v960_v62, %v3838_v49  ;;  %v961_v3 = vmul.f32 %v957_v63, %v3848_v54  ;;  %v958_v4 = vmul.f32 %v954_v0, %v944_v58  ;;  %v955_v5 = vmul.f32 0.044715, %v946_v1  ;;  %1209 = vmatpush2.bf16.msra.mxu1 %v3854_v59  ;;  %v3902_v62 = vld [vmem:[#allocation7 + $0x380] ss:$8 sps:$4 sm:$0xff]  }
 0x195   :  { %1210 = vmatprep.subr.bf16.mxu1 %v3857_v61  ;;  %v949_v63 = vmul.f32 0.5, %v3848_v54  ;;  %v951_v0 = vmul.f32 0.5, %v946_v1 }
 0x196   :  { %v962_v8 = vmul.f32 %v958_v4, %v944_v58  ;;  %v959_v9 = vmul.f32 %v955_v5, %v946_v1  ;;  %v965_v10 = vadd.f32 %v961_v3, %v3848_v54  ;;  %v968_v11 = vmul.f32 0.7978846, %v964_v2 }
 0x197   :  { %v948_v3 = vmul.f32 0.5, %v3838_v49 }
 0x198   :  { %v966_v12 = vadd.f32 %v962_v8, %v944_v58  ;;  %v963_v13 = vmul.f32 %v959_v9, %v946_v1  ;;  %1211 = vmatpush2.bf16.msra.mxu1 %v3865_v6  ;;  %v969_v15 = vmul.f32 0.7978846, %v965_v10 }
 0x199   :  { %1212 = vmatprep.subr.bf16.mxu1 %v3868_v7 }
 0x19a   :  { %v970_v17 = vmul.f32 0.7978846, %v966_v12  ;;  %v967_v18 = vadd.f32 %v963_v13, %v946_v1  ;;  %3392 = vtanh.f32 %v969_v15 }
 0x19b   :  { %3394 = vtanh.f32 %v968_v11 }
 0x19c   :  { %3396 = vtanh.f32 %v970_v17  ;;  %1213 = vmatpush2.bf16.msra.mxu1 %v3872_v14  ;;  %v971_v20 = vmul.f32 0.7978846, %v967_v18 }
 0x19d   :  { %1214 = vmatprep.subr.bf16.mxu1 %v3875_v16 }
 0x19e   :  { %3398 = vtanh.f32 %v971_v20 }
 0x1a0   :  { %1215 = vmatpush2.bf16.msra.mxu1 %v3878_v19 }
 0x1a1   :  { %1216 = vmatprep.subr.bf16.mxu1 %v3881_v21 }
 0x1a4   :  { %1217 = vmatpush2.bf16.msra.mxu1 %v3884_v22 }
 0x1a5   :  { %1218 = vmatprep.subr.bf16.mxu1 %v3887_v23 }
 0x1a7   :  { %v3393_v26 = vpop.eup %3392 }
 0x1a8   :  { %v3395_v28 = vpop.eup %3394  ;;  %1219 = vmatpush2.bf16.msra.mxu1 %v3890_v24  ;;  %v977_v53 = vadd.f32 1.0, %v3393_v26 }
 0x1a9   :  { %v3397_v48 = vpop.eup %3396  ;;  %1220 = vmatprep.subr.bf16.mxu1 %v3893_v25  ;;  %v976_v60 = vadd.f32 1.0, %v3395_v28 }
 0x1aa   :  { %v978_v55 = vadd.f32 1.0, %v3397_v48  ;;  %v981_v5 = vmul.f32 %v977_v53, %v949_v63  ;;  %v3200_v63 = vld [vmem:[#allocation7 + $0x454] ss:$8 sps:$4 sm:$0xff]  }
 0x1ab   :  { %v3399_v56 = vpop.eup %3398  ;;  %v980_v9 = vmul.f32 %v976_v60, %v948_v3  ;;  %v3197_v60 = vld [vmem:[#allocation7 + $0x464] ss:$8 sps:$4 sm:$0xff]   ;;  %v3204_v3 = vld [vmem:[#allocation7 + $0x430] ss:$8 sps:$4 sm:$0xff]  }
 0x1ac   :  { %1221 = vmatpush2.bf16.msra.mxu1 %v3896_v40  ;;  %v979_v2 = vadd.f32 1.0, %v3399_v56  ;;  %v982_v4 = vmul.f32 %v978_v55, %v950_v57  ;;  %v3192_v56 = vld [vmem:[#allocation7 + $0x470] ss:$8 sps:$4 sm:$0xff]   ;;  %v3194_v57 = vld [vmem:[#allocation7 + $0x474] ss:$8 sps:$4 sm:$0xff]  }
 0x1ad   :  { %1222 = vmatprep.subr.bf16.mxu1 %v3899_v51  ;;  %1651 = vmatprep.subr.bf16.mxu0 %v3194_v57 }
 0x1ae   :  { %v983_v8 = vmul.f32 %v979_v2, %v951_v0  ;;  %v984_v10 = vpack.c.bf16 %v982_v4, %v980_v9  ;;  %1652 = vmatpush1.bf16.msra.mxu0 %v3192_v56  ;;  %v3203_v0 = vld [vmem:[#allocation7 + $0x444] ss:$8 sps:$4 sm:$0xff]   ;;  %v3201_v2 = vld [vmem:[#allocation7 + $0x440] ss:$8 sps:$4 sm:$0xff]   ;;  %v3210_v9 = vld [vmem:[#allocation7 + $0x410] ss:$8 sps:$4 sm:$0xff]  }
 0x1af   :  { %1653 = vmatprep.subr.bf16.mxu0 %v3197_v60  ;;  %v3209_v4 = vld [vmem:[#allocation7 + $0x424] ss:$8 sps:$4 sm:$0xff]  }
 0x1b0   :  { %1223 = vmatpush2.bf16.msra.mxu1 %v3902_v62  ;;  %v985_v58 = vpack.c.bf16 %v983_v8, %v981_v5  ;;  %v3207_v5 = vld [vmem:[#allocation7 + $0x420] ss:$8 sps:$4 sm:$0xff]   ;;  %v3212_v8 = vld [vmem:[#allocation7 + $0x414] ss:$8 sps:$4 sm:$0xff]  }
 0x1b1   :  { %1364 = vmatprep.subr.bf16.mxu1 %v3771_v37 }
 0x1b2   :  { %1224 = vmatprep.mubr.bf16.mxu1 %v985_v58  ;;  %v3215_v58 = vld [vmem:[#allocation7 + $0x404] ss:$8 sps:$4 sm:$0xff]  }
 0x1b3   :  { %1225 = vmatmul.mubr.bf16.vlgmr.msra.gmra.mxu1 %v984_v10  ;;  %v3213_v10 = vld [vmem:[#allocation7 + $0x400] ss:$8 sps:$4 sm:$0xff]  }
 0x1b4   :  { %1365 = vmatpush1.bf16.msra.mxu1 %v3791_v27 }
 0x1b5   :  { %1366 = vmatprep.subr.bf16.mxu1 %v3793_v29 }
 0x1b8   :  { %1367 = vmatpush1.bf16.msra.mxu1 %v3796_v30 }
 0x1b9   :  { %1368 = vmatprep.subr.bf16.mxu1 %v3799_v31 }
 0x1bc   :  { %1369 = vmatpush1.bf16.msra.mxu1 %v3802_v32 }
 0x1bd   :  { %1370 = vmatprep.subr.bf16.mxu1 %v3805_v33 }
 0x1c0   :  { %1371 = vmatpush1.bf16.msra.mxu1 %v3808_v34 }
 0x1c1   :  { %1372 = vmatprep.subr.bf16.mxu1 %v3811_v35 }
 0x1c4   :  { %1373 = vmatpush1.bf16.msra.mxu1 %v3814_v36 }
 0x1c5   :  { %1374 = vmatprep.subr.bf16.mxu1 %v3817_v38 }
 0x1c8   :  { %1375 = vmatpush1.bf16.msra.mxu1 %v3820_v39 }
 0x1c9   :  { %1376 = vmatprep.subr.bf16.mxu1 %v3823_v42 }
 0x1cb   :  { %v1317_v37 = vpop.f32.mrf.mxu0 }
 0x1cc   :  { %v1318_v27 = vadd.f32 %v1317_v37, %v3827_v44  ;;  %1377 = vmatpush1.bf16.msra.mxu1 %v3829_v45  ;;  %v3218_v37 = vld [vmem:[#allocation7 + $0x4f4] ss:$8 sps:$4 sm:$0xff]  }
 0x1cd   :  { %v1319_v29 = vpop.f32.mrf.mxu0  ;;  %1378 = vmatprep.subr.bf16.mxu1 %v3832_v46 }
 0x1ce   :  { %v1330_v30 = vmul.f32 0.044715, %v1318_v27  ;;  %v1320_v31 = vadd.f32 %v1319_v29, %v3835_v47  ;;  %v3221_v29 = vld [vmem:[#allocation7 + $0x4e4] ss:$8 sps:$4 sm:$0xff]  }
 0x1cf   :  { %v1321_v32 = vpop.f32.mrf.mxu0 }
 0x1d0   :  { %v1334_v33 = vmul.f32 %v1330_v30, %v1318_v27  ;;  %v1331_v34 = vmul.f32 0.044715, %v1320_v31  ;;  %v1322_v35 = vadd.f32 %v1321_v32, %v3827_v44  ;;  %1379 = vmatpush1.bf16.msra.mxu1 %v3841_v50  ;;  %v3219_v30 = vld [vmem:[#allocation7 + $0x4e0] ss:$8 sps:$4 sm:$0xff]   ;;  %v3222_v32 = vld [vmem:[#allocation7 + $0x4d0] ss:$8 sps:$4 sm:$0xff]  }
 0x1d1   :  { %v1323_v36 = vpop.f32.mrf.mxu0  ;;  %1380 = vmatprep.subr.bf16.mxu1 %v3844_v52 }
 0x1d2   :  { %v1338_v38 = vmul.f32 %v1334_v33, %v1318_v27  ;;  %v1335_v39 = vmul.f32 %v1331_v34, %v1320_v31  ;;  %v1332_v42 = vmul.f32 0.044715, %v1322_v35  ;;  %v1324_v45 = vadd.f32 %v1323_v36, %v3835_v47  ;;  %v3227_v33 = vld [vmem:[#allocation7 + $0x4c4] ss:$8 sps:$4 sm:$0xff]   ;;  %v3225_v34 = vld [vmem:[#allocation7 + $0x4c0] ss:$8 sps:$4 sm:$0xff]  }
 0x1d3   :  { %v3228_v36 = vld [vmem:[#allocation7 + $0x4b0] ss:$8 sps:$4 sm:$0xff]  }
 0x1d4   :  { %v1342_v49 = vadd.f32 %v1338_v38, %v1318_v27  ;;  %v1339_v46 = vmul.f32 %v1335_v39, %v1320_v31  ;;  %v1336_v54 = vmul.f32 %v1332_v42, %v1322_v35  ;;  %v1333_v1 = vmul.f32 0.044715, %v1324_v45  ;;  %1381 = vmatpush2.bf16.msra.mxu1 %v3854_v59  ;;  %v3233_v38 = vld [vmem:[#allocation7 + $0x4a4] ss:$8 sps:$4 sm:$0xff]   ;;  %v3231_v39 = vld [vmem:[#allocation7 + $0x4a0] ss:$8 sps:$4 sm:$0xff]  }
 0x1d5   :  { %1382 = vmatprep.subr.bf16.mxu1 %v3857_v61  ;;  %v3236_v42 = vld [vmem:[#allocation7 + $0x494] ss:$8 sps:$4 sm:$0xff]  }
 0x1d6   :  { %v1340_v11 = vmul.f32 %v1336_v54, %v1322_v35  ;;  %v1337_v44 = vmul.f32 %v1333_v1, %v1324_v45  ;;  %v1343_v12 = vadd.f32 %v1339_v46, %v1320_v31  ;;  %v1346_v50 = vmul.f32 0.7978846, %v1342_v49  ;;  %v3239_v49 = vld [vmem:[#allocation7 + $0x484] ss:$8 sps:$4 sm:$0xff]   ;;  %v3237_v46 = vld [vmem:[#allocation7 + $0x480] ss:$8 sps:$4 sm:$0xff]  }
 0x1d7   :  { %v3240_v54 = vld [vmem:[#allocation7 + $0x570] ss:$8 sps:$4 sm:$0xff]   ;;  %v3242_v1 = vld [vmem:[#allocation7 + $0x574] ss:$8 sps:$4 sm:$0xff]  }
 0x1d8   :  { %v1344_v13 = vadd.f32 %v1340_v11, %v1322_v35  ;;  %v1341_v15 = vmul.f32 %v1337_v44, %v1324_v45  ;;  %1383 = vmatpush2.bf16.msra.mxu1 %v3865_v6  ;;  %v1347_v52 = vmul.f32 0.7978846, %v1343_v12  ;;  %v3245_v11 = vld [vmem:[#allocation7 + $0x564] ss:$8 sps:$4 sm:$0xff]   ;;  %v3243_v44 = vld [vmem:[#allocation7 + $0x560] ss:$8 sps:$4 sm:$0xff]  }
 0x1d9   :  { %1384 = vmatprep.subr.bf16.mxu1 %v3868_v7  ;;  %v3248_v12 = vld [vmem:[#allocation7 + $0x554] ss:$8 sps:$4 sm:$0xff]  }
 0x1da   :  { %v1348_v47 = vmul.f32 0.7978846, %v1344_v13  ;;  %v1345_v17 = vadd.f32 %v1341_v15, %v1324_v45  ;;  %3400 = vtanh.f32 %v1347_v52  ;;  %v3251_v13 = vld [vmem:[#allocation7 + $0x544] ss:$8 sps:$4 sm:$0xff]   ;;  %v3249_v15 = vld [vmem:[#allocation7 + $0x540] ss:$8 sps:$4 sm:$0xff]  }
 0x1db   :  { %3402 = vtanh.f32 %v1346_v50  ;;  %v3246_v50 = vld [vmem:[#allocation7 + $0x550] ss:$8 sps:$4 sm:$0xff]   ;;  %v3254_v52 = vld [vmem:[#allocation7 + $0x534] ss:$8 sps:$4 sm:$0xff]  }
 0x1dc   :  { %3404 = vtanh.f32 %v1348_v47  ;;  %1385 = vmatpush2.bf16.msra.mxu1 %v3872_v14  ;;  %v1349_v59 = vmul.f32 0.7978846, %v1345_v17  ;;  %v3252_v47 = vld [vmem:[#allocation7 + $0x530] ss:$8 sps:$4 sm:$0xff]   ;;  %v3257_v17 = vld [vmem:[#allocation7 + $0x524] ss:$8 sps:$4 sm:$0xff]  }
 0x1dd   :  { %1386 = vmatprep.subr.bf16.mxu1 %v3875_v16  ;;  %v1328_v16 = vmul.f32 0.5, %v1322_v35  ;;  %v3230_v35 = vld [vmem:[#allocation7 + $0x4b4] ss:$8 sps:$4 sm:$0xff]  }
 0x1de   :  { %3406 = vtanh.f32 %v1349_v59  ;;  %v3255_v59 = vld [vmem:[#allocation7 + $0x520] ss:$8 sps:$4 sm:$0xff]  }
 0x1e0   :  { %1387 = vmatpush2.bf16.msra.mxu1 %v3878_v19  ;;  %v1327_v19 = vmul.f32 0.5, %v1320_v31  ;;  %v3224_v31 = vld [vmem:[#allocation7 + $0x4d4] ss:$8 sps:$4 sm:$0xff]  }
 0x1e1   :  { %1388 = vmatprep.subr.bf16.mxu1 %v3881_v21  ;;  %v1329_v21 = vmul.f32 0.5, %v1324_v45  ;;  %v3234_v45 = vld [vmem:[#allocation7 + $0x490] ss:$8 sps:$4 sm:$0xff]  }
 0x1e4   :  { %1389 = vmatpush2.bf16.msra.mxu1 %v3884_v22  ;;  %v1326_v22 = vmul.f32 0.5, %v1318_v27  ;;  %v3216_v27 = vld [vmem:[#allocation7 + $0x4f0] ss:$8 sps:$4 sm:$0xff]  }
 0x1e5   :  { %1390 = vmatprep.subr.bf16.mxu1 %v3887_v23 }
 0x1e7   :  { %v3401_v61 = vpop.eup %3400 }
 0x1e8   :  { %v3403_v6 = vpop.eup %3402  ;;  %1391 = vmatpush2.bf16.msra.mxu1 %v3890_v24  ;;  %v1355_v14 = vadd.f32 1.0, %v3401_v61 }
 0x1e9   :  { %v3405_v7 = vpop.eup %3404  ;;  %1392 = vmatprep.subr.bf16.mxu1 %v3893_v25  ;;  %v1354_v26 = vadd.f32 1.0, %v3403_v6 }
 0x1ea   :  { %v1356_v18 = vadd.f32 1.0, %v3405_v7  ;;  %v1359_v48 = vmul.f32 %v1355_v14, %v1327_v19 }
 0x1eb   :  { %v3407_v20 = vpop.eup %3406  ;;  %v1358_v24 = vmul.f32 %v1354_v26, %v1326_v22  ;;  %v1020_v26 = vld [vmem:[#allocation9 + $0x6] sm:$0x3] }
 0x1ec   :  { %1393 = vmatpush2.bf16.msra.mxu1 %v3896_v40  ;;  %v1357_v28 = vadd.f32 1.0, %v3407_v20  ;;  %v1360_v23 = vmul.f32 %v1356_v18, %v1328_v16  ;;  %v3195_v40 = vld [vmem:[#allocation7 + $0x460] ss:$8 sps:$4 sm:$0xff]   ;;  %v3964_v22 = vrot.slane %v1020_v26, %v3787_v43 }
 0x1ed   :  { %1394 = vmatprep.subr.bf16.mxu1 %v3899_v51  ;;  %1654 = vmatpush1.bf16.msra.mxu0 %v3195_v40  ;;  %v3198_v51 = vld [vmem:[#allocation7 + $0x450] ss:$8 sps:$4 sm:$0xff]  }
 0x1ee   :  { %v1361_v53 = vmul.f32 %v1357_v28, %v1329_v21  ;;  %v1362_v55 = vpack.c.bf16 %v1360_v23, %v1358_v24  ;;  %1655 = vmatprep.subr.bf16.mxu0 %v3200_v63  ;;  %v3961_v21 = vrot.slane %v1020_v26, %v3785_v41  ;;  %v3264_v26 = vld [vmem:[#allocation7 + $0x5f0] ss:$8 sps:$4 sm:$0xff]  }
 0x1f0   :  { %1395 = vmatpush2.bf16.msra.mxu1 %v3902_v62  ;;  %v1363_v25 = vpack.c.bf16 %v1361_v53, %v1359_v48  ;;  %v3206_v62 = vld [vmem:[#allocation7 + $0x434] ss:$8 sps:$4 sm:$0xff]  }
 0x1f1   :  { %1656 = vmatpush1.bf16.msra.mxu0 %v3198_v51  ;;  %1938 = vmatprep.subr.bf16.mxu1 %v3242_v1 }
 0x1f2   :  { %1396 = vmatprep.mubr.bf16.mxu1 %v1363_v25  ;;  %1657 = vmatprep.subr.bf16.mxu0 %v3203_v0 }
 0x1f3   :  { %1397 = vmatmul.mubr.bf16.vlgmr.msra.gmra.mxu1 %v1362_v55 }
 0x1f4   :  { %1939 = vmatpush1.bf16.msra.mxu1 %v3240_v54 }
 0x1f5   :  { %1658 = vmatpush1.bf16.msra.mxu0 %v3201_v2  ;;  %1940 = vmatprep.subr.bf16.mxu1 %v3245_v11 }
 0x1f6   :  { %1659 = vmatprep.subr.bf16.mxu0 %v3206_v62 }
 0x1f8   :  { %1941 = vmatpush1.bf16.msra.mxu1 %v3243_v44 }
 0x1f9   :  { %1660 = vmatpush1.bf16.msra.mxu0 %v3204_v3  ;;  %1942 = vmatprep.subr.bf16.mxu1 %v3248_v12 }
 0x1fa   :  { %1661 = vmatprep.subr.bf16.mxu0 %v3209_v4 }
 0x1fc   :  { %1943 = vmatpush1.bf16.msra.mxu1 %v3246_v50 }
 0x1fd   :  { %1662 = vmatpush1.bf16.msra.mxu0 %v3207_v5  ;;  %1944 = vmatprep.subr.bf16.mxu1 %v3251_v13 }
 0x1fe   :  { %1663 = vmatprep.subr.bf16.mxu0 %v3212_v8 }
 0x200   :  { %1945 = vmatpush1.bf16.msra.mxu1 %v3249_v15  ;;  %v3260_v15 = vld [vmem:[#allocation7 + $0x514] ss:$8 sps:$4 sm:$0xff]  }
 0x201   :  { %1664 = vmatpush1.bf16.msra.mxu0 %v3210_v9  ;;  %1946 = vmatprep.subr.bf16.mxu1 %v3254_v52  ;;  %v3258_v52 = vld [vmem:[#allocation7 + $0x510] ss:$8 sps:$4 sm:$0xff]  }
 0x202   :  { %1665 = vmatprep.subr.bf16.mxu0 %v3215_v58 }
 0x204   :  { %1947 = vmatpush1.bf16.msra.mxu1 %v3252_v47  ;;  %v3263_v47 = vld [vmem:[#allocation7 + $0x504] ss:$8 sps:$4 sm:$0xff]  }
 0x205   :  { %1666 = vmatpush1.bf16.msra.mxu0 %v3213_v10  ;;  %1948 = vmatprep.subr.bf16.mxu1 %v3257_v17  ;;  %v3261_v17 = vld [vmem:[#allocation7 + $0x500] ss:$8 sps:$4 sm:$0xff]  }
 0x206   :  { %1667 = vmatprep.subr.bf16.mxu0 %v3218_v37 }
 0x208   :  { %1949 = vmatpush1.bf16.msra.mxu1 %v3255_v59  ;;  %v3266_v59 = vld [vmem:[#allocation7 + $0x5f4] ss:$8 sps:$4 sm:$0xff]  }
 0x209   :  { %1668 = vmatpush2.bf16.msra.mxu0 %v3216_v27  ;;  %1950 = vmatprep.subr.bf16.mxu1 %v3260_v15 }
 0x20a   :  { %1669 = vmatprep.subr.bf16.mxu0 %v3221_v29 }
 0x20c   :  { %1951 = vmatpush1.bf16.msra.mxu1 %v3258_v52 }
 0x20d   :  { %1670 = vmatpush2.bf16.msra.mxu0 %v3219_v30  ;;  %1952 = vmatprep.subr.bf16.mxu1 %v3263_v47 }
 0x20e   :  { %1671 = vmatprep.subr.bf16.mxu0 %v3224_v31 }
 0x210   :  { %1953 = vmatpush1.bf16.msra.mxu1 %v3261_v17 }
 0x211   :  { %1672 = vmatpush2.bf16.msra.mxu0 %v3222_v32  ;;  %1954 = vmatprep.subr.bf16.mxu1 %v3266_v59 }
 0x212   :  { %1673 = vmatprep.subr.bf16.mxu0 %v3227_v33 }
 0x214   :  { %1955 = vmatpush2.bf16.msra.mxu1 %v3264_v26 }
 0x215   :  { %1674 = vmatpush2.bf16.msra.mxu0 %v3225_v34 }
 0x216   :  { %1675 = vmatprep.subr.bf16.mxu0 %v3230_v35 }
 0x219   :  { %1676 = vmatpush2.bf16.msra.mxu0 %v3228_v36 }
 0x21a   :  { %1677 = vmatprep.subr.bf16.mxu0 %v3233_v38 }
 0x21d   :  { %1678 = vmatpush2.bf16.msra.mxu0 %v3231_v39 }
 0x21e   :  { %1679 = vmatprep.subr.bf16.mxu0 %v3236_v42 }
 0x221   :  { %1680 = vmatpush2.bf16.msra.mxu0 %v3234_v45 }
 0x222   :  { %1681 = vmatprep.subr.bf16.mxu0 %v3239_v49 }
 0x225   :  { %1682 = vmatpush2.bf16.msra.mxu0 %v3237_v46 }
 0x233   :  { %v3944_v61 = vpop.f32.mrf.mxu1 }
 0x235   :  { %v3946_v6 = vpop.f32.mrf.mxu1 }
 0x237   :  { %v3948_v7 = vpop.f32.mrf.mxu1 }
 0x239   :  { %v3950_v14 = vpop.f32.mrf.mxu1 }
 0x273   :  { %v3952_v18 = vpop.f32.mrf.mxu1 }
 0x275   :  { %v3954_v20 = vpop.f32.mrf.mxu1 }
 0x277   :  { %v3956_v16 = vpop.f32.mrf.mxu1 }
 0x279   :  { %v3958_v19 = vpop.f32.mrf.mxu1 }
 0x2b3   :  { %v1398_v28 = vpop.f32.mrf.mxu1 }
 0x2b4   :  { %v1399_v23 = vadd.f32 %v1398_v28, %v3961_v21  ;;  %v3269_v28 = vld [vmem:[#allocation7 + $0x5e4] ss:$8 sps:$4 sm:$0xff]  }
 0x2b5   :  { %v1400_v48 = vpop.f32.mrf.mxu1  ;;  %1956 = vmatprep.subr.bf16.mxu1 %v3269_v28 }
 0x2b6   :  { %v1411_v53 = vmul.f32 0.044715, %v1399_v23  ;;  %v1401_v24 = vadd.f32 %v1400_v48, %v3964_v22  ;;  %v1407_v54 = vmul.f32 0.5, %v1399_v23  ;;  %v3272_v48 = vld [vmem:[#allocation7 + $0x5d4] ss:$8 sps:$4 sm:$0xff]  }
 0x2b7   :  { %v1402_v25 = vpop.f32.mrf.mxu1 }
 0x2b8   :  { %v1415_v55 = vmul.f32 %v1411_v53, %v1399_v23  ;;  %v1412_v56 = vmul.f32 0.044715, %v1401_v24  ;;  %v1403_v57 = vadd.f32 %v1402_v25, %v3961_v21  ;;  %v1408_v45 = vmul.f32 0.5, %v1401_v24  ;;  %v3270_v53 = vld [vmem:[#allocation7 + $0x5d0] ss:$8 sps:$4 sm:$0xff]  }
 0x2b9   :  { %v1404_v60 = vpop.f32.mrf.mxu1  ;;  %v3273_v25 = vld [vmem:[#allocation7 + $0x5c0] ss:$8 sps:$4 sm:$0xff]  }
 0x2ba   :  { %v1419_v40 = vmul.f32 %v1415_v55, %v1399_v23  ;;  %v1416_v63 = vmul.f32 %v1412_v56, %v1401_v24  ;;  %v1413_v51 = vmul.f32 0.044715, %v1403_v57  ;;  %v1405_v0 = vadd.f32 %v1404_v60, %v3964_v22  ;;  %v3278_v55 = vld [vmem:[#allocation7 + $0x5b4] ss:$8 sps:$4 sm:$0xff]   ;;  %v3276_v56 = vld [vmem:[#allocation7 + $0x5b0] ss:$8 sps:$4 sm:$0xff]  }
 0x2bb   :  { %v1409_v39 = vmul.f32 0.5, %v1403_v57  ;;  %v3279_v60 = vld [vmem:[#allocation7 + $0x5a0] ss:$8 sps:$4 sm:$0xff]  }
 0x2bc   :  { %v1423_v2 = vadd.f32 %v1419_v40, %v1399_v23  ;;  %v1420_v62 = vmul.f32 %v1416_v63, %v1401_v24  ;;  %v1417_v3 = vmul.f32 %v1413_v51, %v1403_v57  ;;  %v1414_v4 = vmul.f32 0.044715, %v1405_v0  ;;  %v3267_v23 = vld [vmem:[#allocation7 + $0x5e0] ss:$8 sps:$4 sm:$0xff]   ;;  %v3284_v40 = vld [vmem:[#allocation7 + $0x594] ss:$8 sps:$4 sm:$0xff]  }
 0x2bd   :  { %v1410_v49 = vmul.f32 0.5, %v1405_v0  ;;  %1957 = vmatpush2.bf16.msra.mxu1 %v3267_v23  ;;  %v3282_v63 = vld [vmem:[#allocation7 + $0x590] ss:$8 sps:$4 sm:$0xff]   ;;  %v3287_v51 = vld [vmem:[#allocation7 + $0x584] ss:$8 sps:$4 sm:$0xff]  }
 0x2be   :  { %v1421_v5 = vmul.f32 %v1417_v3, %v1403_v57  ;;  %v1418_v8 = vmul.f32 %v1414_v4, %v1405_v0  ;;  %v1424_v9 = vadd.f32 %v1420_v62, %v1401_v24  ;;  %v1427_v58 = vmul.f32 0.7978846, %v1423_v2  ;;  %1958 = vmatprep.subr.bf16.mxu1 %v3272_v48  ;;  %v3275_v24 = vld [vmem:[#allocation7 + $0x5c4] ss:$8 sps:$4 sm:$0xff]   ;;  %v3288_v2 = vld [vmem:[#allocation7 + $0x670] ss:$8 sps:$4 sm:$0xff]  }
 0x2bf   :  { %v3290_v62 = vld [vmem:[#allocation7 + $0x674] ss:$8 sps:$4 sm:$0xff]   ;;  %v3296_v4 = vld [vmem:[#allocation7 + $0x664] ss:$8 sps:$4 sm:$0xff]  }
 0x2c0   :  { %v1425_v10 = vadd.f32 %v1421_v5, %v1403_v57  ;;  %v1422_v37 = vmul.f32 %v1418_v8, %v1405_v0  ;;  %v1428_v27 = vmul.f32 0.7978846, %v1424_v9  ;;  %v3281_v57 = vld [vmem:[#allocation7 + $0x5a4] ss:$8 sps:$4 sm:$0xff]   ;;  %v3293_v3 = vld [vmem:[#allocation7 + $0x774] ss:$8 sps:$4 sm:$0xff]   ;;  %2229 = vmatprep.subr.bf16.mxu0 %v3290_v62 }
 0x2c1   :  { %1959 = vmatpush2.bf16.msra.mxu1 %v3270_v53  ;;  %v3294_v5 = vld [vmem:[#allocation7 + $0x660] ss:$8 sps:$4 sm:$0xff]   ;;  %v3302_v8 = vld [vmem:[#allocation7 + $0x654] ss:$8 sps:$4 sm:$0xff]   ;;  %v3300_v9 = vld [vmem:[#allocation7 + $0x650] ss:$8 sps:$4 sm:$0xff]  }
 0x2c2   :  { %v1429_v29 = vmul.f32 0.7978846, %v1425_v10  ;;  %v1426_v30 = vadd.f32 %v1422_v37, %v1405_v0  ;;  %3408 = vtanh.f32 %v1428_v27  ;;  %1960 = vmatprep.subr.bf16.mxu1 %v3275_v24  ;;  %v3285_v0 = vld [vmem:[#allocation7 + $0x580] ss:$8 sps:$4 sm:$0xff]   ;;  %v3314_v37 = vld [vmem:[#allocation7 + $0x634] ss:$8 sps:$4 sm:$0xff]  }
 0x2c3   :  { %3410 = vtanh.f32 %v1427_v58  ;;  %v3308_v58 = vld [vmem:[#allocation7 + $0x644] ss:$8 sps:$4 sm:$0xff]   ;;  %v3306_v10 = vld [vmem:[#allocation7 + $0x640] ss:$8 sps:$4 sm:$0xff]   ;;  %v3312_v27 = vld [vmem:[#allocation7 + $0x630] ss:$8 sps:$4 sm:$0xff]  }
 0x2c4   :  { %3412 = vtanh.f32 %v1429_v29  ;;  %v1430_v31 = vmul.f32 0.7978846, %v1426_v30  ;;  %v3320_v29 = vld [vmem:[#allocation7 + $0x624] ss:$8 sps:$4 sm:$0xff]   ;;  %v3318_v30 = vld [vmem:[#allocation7 + $0x620] ss:$8 sps:$4 sm:$0xff]  }
 0x2c5   :  { %1961 = vmatpush2.bf16.msra.mxu1 %v3273_v25 }
 0x2c6   :  { %3414 = vtanh.f32 %v1430_v31  ;;  %1962 = vmatprep.subr.bf16.mxu1 %v3278_v55  ;;  %v1479_v31 = vld [vmem:[#allocation9 + $0x8] sm:$0x3] }
 0x2c9   :  { %1963 = vmatpush2.bf16.msra.mxu1 %v3276_v56 }
 0x2ca   :  { %1964 = vmatprep.subr.bf16.mxu1 %v3281_v57 }
 0x2cd   :  { %1965 = vmatpush2.bf16.msra.mxu1 %v3279_v60 }
 0x2ce   :  { %1966 = vmatprep.subr.bf16.mxu1 %v3284_v40 }
 0x2cf   :  { %v3409_v32 = vpop.eup %3408 }
 0x2d0   :  { %v3411_v33 = vpop.eup %3410  ;;  %v1436_v35 = vadd.f32 1.0, %v3409_v32  ;;  %v1484_v32 = vrot.slane %v1479_v31, %v3785_v41 }
 0x2d1   :  { %v3413_v34 = vpop.eup %3412  ;;  %v1435_v42 = vadd.f32 1.0, %v3411_v33  ;;  %1967 = vmatpush2.bf16.msra.mxu1 %v3282_v63  ;;  %v1488_v33 = vrot.slane %v1479_v31, %v3787_v43  ;;  %v3305_v31 = vld [vmem:[#allocation7 + $0x754] ss:$8 sps:$4 sm:$0xff]  }
 0x2d2   :  { %v1437_v36 = vadd.f32 1.0, %v3413_v34  ;;  %v1440_v11 = vmul.f32 %v1436_v35, %v1408_v45  ;;  %1968 = vmatprep.subr.bf16.mxu1 %v3287_v51 }
 0x2d3   :  { %v3415_v38 = vpop.eup %3414  ;;  %v1439_v12 = vmul.f32 %v1435_v42, %v1407_v54 }
 0x2d4   :  { %v1438_v46 = vadd.f32 1.0, %v3415_v38  ;;  %v1441_v1 = vmul.f32 %v1437_v36, %v1409_v39 }
 0x2d5   :  { %1969 = vmatpush2.bf16.msra.mxu1 %v3285_v0 }
 0x2d6   :  { %v1442_v44 = vmul.f32 %v1438_v46, %v1410_v49  ;;  %v1443_v13 = vpack.c.bf16 %v1441_v1, %v1439_v12  ;;  %2484 = vmatprep.subr.bf16.mxu1 %v3293_v3 }
 0x2d8   :  { %v1444_v50 = vpack.c.bf16 %v1442_v44, %v1440_v11 }
 0x2da   :  { %1683 = vmatprep.mubr.bf16.mxu0 %v1444_v50 }
 0x2db   :  { %1684 = vmatmul.mubr.bf16.vlgmr.msra.gmra.mxu0 %v1443_v13 }
 0x2dc   :  { %2230 = vmatpush1.bf16.msra.mxu0 %v3288_v2 }
 0x2dd   :  { %2231 = vmatprep.subr.bf16.mxu0 %v3296_v4 }
 0x2e0   :  { %2232 = vmatpush1.bf16.msra.mxu0 %v3294_v5 }
 0x2e1   :  { %2233 = vmatprep.subr.bf16.mxu0 %v3302_v8 }
 0x2e4   :  { %2234 = vmatpush1.bf16.msra.mxu0 %v3300_v9 }
 0x2e5   :  { %2235 = vmatprep.subr.bf16.mxu0 %v3308_v58 }
 0x2e8   :  { %2236 = vmatpush1.bf16.msra.mxu0 %v3306_v10 }
 0x2e9   :  { %2237 = vmatprep.subr.bf16.mxu0 %v3314_v37  ;;  %v3291_v37 = vld [vmem:[#allocation7 + $0x770] ss:$8 sps:$4 sm:$0xff]  }
 0x2ec   :  { %2238 = vmatpush1.bf16.msra.mxu0 %v3312_v27 }
 0x2ed   :  { %2239 = vmatprep.subr.bf16.mxu0 %v3320_v29  ;;  %v3299_v29 = vld [vmem:[#allocation7 + $0x764] ss:$8 sps:$4 sm:$0xff]  }
 0x2f0   :  { %2240 = vmatpush1.bf16.msra.mxu0 %v3318_v30  ;;  %v3297_v30 = vld [vmem:[#allocation7 + $0x760] ss:$8 sps:$4 sm:$0xff]  }
 0x39b   :  { %v1685_v34 = vpop.f32.mrf.mxu0 }
 0x39c   :  { %v1686_v35 = vadd.f32 %v1685_v34, %v1484_v32  ;;  %v3309_v34 = vld [vmem:[#allocation7 + $0x740] ss:$8 sps:$4 sm:$0xff]  }
 0x39d   :  { %v1687_v36 = vpop.f32.mrf.mxu0 }
 0x39e   :  { %v1698_v38 = vmul.f32 0.044715, %v1686_v35  ;;  %v1688_v39 = vadd.f32 %v1687_v36, %v1488_v33  ;;  %v1694_v4 = vmul.f32 0.5, %v1686_v35  ;;  %v3315_v36 = vld [vmem:[#allocation7 + $0x730] ss:$8 sps:$4 sm:$0xff]  }
 0x39f   :  { %v1689_v42 = vpop.f32.mrf.mxu0 }
 0x3a0   :  { %v1702_v45 = vmul.f32 %v1698_v38, %v1686_v35  ;;  %v1699_v49 = vmul.f32 0.044715, %v1688_v39  ;;  %v1690_v46 = vadd.f32 %v1689_v42, %v1484_v32  ;;  %v1695_v2 = vmul.f32 0.5, %v1688_v39  ;;  %v3303_v32 = vld [vmem:[#allocation7 + $0x750] ss:$8 sps:$4 sm:$0xff]  }
 0x3a1   :  { %v1691_v54 = vpop.f32.mrf.mxu0  ;;  %v3323_v38 = vld [vmem:[#allocation7 + $0x724] ss:$8 sps:$4 sm:$0xff]   ;;  %v3326_v42 = vld [vmem:[#allocation7 + $0x614] ss:$8 sps:$4 sm:$0xff]  }
 0x3a2   :  { %v1706_v1 = vmul.f32 %v1702_v45, %v1686_v35  ;;  %v1703_v11 = vmul.f32 %v1699_v49, %v1688_v39  ;;  %v1700_v44 = vmul.f32 0.044715, %v1690_v46  ;;  %v1692_v12 = vadd.f32 %v1691_v54, %v1488_v33  ;;  %v3311_v33 = vld [vmem:[#allocation7 + $0x744] ss:$8 sps:$4 sm:$0xff]   ;;  %v3329_v45 = vld [vmem:[#allocation7 + $0x714] ss:$8 sps:$4 sm:$0xff]   ;;  %2241 = vmatprep.subr.bf16.mxu0 %v3326_v42 }
 0x3a3   :  { %v1696_v51 = vmul.f32 0.5, %v1690_v46  ;;  %v3324_v49 = vld [vmem:[#allocation7 + $0x610] ss:$8 sps:$4 sm:$0xff]   ;;  %v3332_v54 = vld [vmem:[#allocation7 + $0x604] ss:$8 sps:$4 sm:$0xff]  }
 0x3a4   :  { %v1710_v50 = vadd.f32 %v1706_v1, %v1686_v35  ;;  %v1707_v13 = vmul.f32 %v1703_v11, %v1688_v39  ;;  %v1704_v15 = vmul.f32 %v1700_v44, %v1690_v46  ;;  %v1701_v52 = vmul.f32 0.044715, %v1692_v12  ;;  %v3317_v35 = vld [vmem:[#allocation7 + $0x734] ss:$8 sps:$4 sm:$0xff]   ;;  %2242 = vmatpush1.bf16.msra.mxu0 %v3324_v49  ;;  %v3335_v1 = vld [vmem:[#allocation7 + $0x704] ss:$8 sps:$4 sm:$0xff]  }
 0x3a5   :  { %v1697_v62 = vmul.f32 0.5, %v1692_v12  ;;  %v3330_v11 = vld [vmem:[#allocation7 + $0x600] ss:$8 sps:$4 sm:$0xff]   ;;  %2243 = vmatprep.subr.bf16.mxu0 %v3332_v54 }
 0x3a6   :  { %v1708_v47 = vmul.f32 %v1704_v15, %v1690_v46  ;;  %v1705_v17 = vmul.f32 %v1701_v52, %v1692_v12  ;;  %v1711_v59 = vadd.f32 %v1707_v13, %v1688_v39  ;;  %v1714_v26 = vmul.f32 0.7978846, %v1710_v50  ;;  %v3321_v39 = vld [vmem:[#allocation7 + $0x720] ss:$8 sps:$4 sm:$0xff]   ;;  %v3341_v50 = vld [vmem:[#allocation7 + $0x7f4] ss:$8 sps:$4 sm:$0xff]  }
 0x3a7   :  { %v3333_v44 = vld [vmem:[#allocation7 + $0x700] ss:$8 sps:$4 sm:$0xff]   ;;  %v3336_v13 = vld [vmem:[#allocation7 + $0x6f0] ss:$8 sps:$4 sm:$0xff]   ;;  %v3344_v52 = vld [vmem:[#allocation7 + $0x6e4] ss:$8 sps:$4 sm:$0xff]  }
 0x3a8   :  { %v1712_v28 = vadd.f32 %v1708_v47, %v1690_v46  ;;  %v1709_v23 = vmul.f32 %v1705_v17, %v1692_v12  ;;  %v1715_v48 = vmul.f32 0.7978846, %v1711_v59  ;;  %v3327_v46 = vld [vmem:[#allocation7 + $0x710] ss:$8 sps:$4 sm:$0xff]   ;;  %2244 = vmatpush1.bf16.msra.mxu0 %v3330_v11  ;;  %v3347_v47 = vld [vmem:[#allocation7 + $0x7e4] ss:$8 sps:$4 sm:$0xff]  }
 0x3a9   :  { %v3339_v15 = vld [vmem:[#allocation7 + $0x7f0] ss:$8 sps:$4 sm:$0xff]   ;;  %v3342_v17 = vld [vmem:[#allocation7 + $0x6e0] ss:$8 sps:$4 sm:$0xff]  }
 0x3aa   :  { %v1716_v53 = vmul.f32 0.7978846, %v1712_v28  ;;  %v1713_v24 = vadd.f32 %v1709_v23, %v1692_v12  ;;  %3416 = vtanh.f32 %v1715_v48  ;;  %v3338_v12 = vld [vmem:[#allocation7 + $0x6f4] ss:$8 sps:$4 sm:$0xff]   ;;  %v3345_v59 = vld [vmem:[#allocation7 + $0x7e0] ss:$8 sps:$4 sm:$0xff]  }
 0x3ab   :  { %3418 = vtanh.f32 %v1714_v26  ;;  %2245 = vmatprep.subr.bf16.mxu0 %v3338_v12  ;;  %v3350_v26 = vld [vmem:[#allocation7 + $0x6d4] ss:$8 sps:$4 sm:$0xff]   ;;  %v3348_v23 = vld [vmem:[#allocation7 + $0x6d0] ss:$8 sps:$4 sm:$0xff]  }
 0x3ac   :  { %3420 = vtanh.f32 %v1716_v53  ;;  %v1717_v25 = vmul.f32 0.7978846, %v1713_v24  ;;  %2246 = vmatpush2.bf16.msra.mxu0 %v3336_v13  ;;  %v3353_v28 = vld [vmem:[#allocation7 + $0x7d4] ss:$8 sps:$4 sm:$0xff]   ;;  %v3351_v48 = vld [vmem:[#allocation7 + $0x7d0] ss:$8 sps:$4 sm:$0xff]  }
 0x3ad   :  { %2247 = vmatprep.subr.bf16.mxu0 %v3344_v52  ;;  %v3356_v53 = vld [vmem:[#allocation7 + $0x6c4] ss:$8 sps:$4 sm:$0xff]  }
 0x3ae   :  { %3422 = vtanh.f32 %v1717_v25  ;;  %v3359_v24 = vld [vmem:[#allocation7 + $0x7c4] ss:$8 sps:$4 sm:$0xff]   ;;  %v3354_v25 = vld [vmem:[#allocation7 + $0x6c0] ss:$8 sps:$4 sm:$0xff]  }
 0x3b0   :  { %2248 = vmatpush2.bf16.msra.mxu0 %v3342_v17 }
 0x3b1   :  { %2249 = vmatprep.subr.bf16.mxu0 %v3350_v26 }
 0x3b4   :  { %2250 = vmatpush2.bf16.msra.mxu0 %v3348_v23 }
 0x3b5   :  { %2251 = vmatprep.subr.bf16.mxu0 %v3356_v53 }
 0x3b7   :  { %v3417_v55 = vpop.eup %3416 }
 0x3b8   :  { %v3419_v56 = vpop.eup %3418  ;;  %v1723_v60 = vadd.f32 1.0, %v3417_v55  ;;  %v3357_v55 = vld [vmem:[#allocation7 + $0x7c0] ss:$8 sps:$4 sm:$0xff]   ;;  %2252 = vmatpush2.bf16.msra.mxu0 %v3354_v25 }
 0x3b9   :  { %v3421_v57 = vpop.eup %3420  ;;  %v1722_v0 = vadd.f32 1.0, %v3419_v56  ;;  %v3362_v56 = vld [vmem:[#allocation7 + $0x6b4] ss:$8 sps:$4 sm:$0xff]  }
 0x3ba   :  { %v1724_v40 = vadd.f32 1.0, %v3421_v57  ;;  %v1727_v8 = vmul.f32 %v1723_v60, %v1695_v2  ;;  %v3365_v57 = vld [vmem:[#allocation7 + $0x7b4] ss:$8 sps:$4 sm:$0xff]   ;;  %v3360_v60 = vld [vmem:[#allocation7 + $0x6b0] ss:$8 sps:$4 sm:$0xff]   ;;  %2253 = vmatprep.subr.bf16.mxu0 %v3362_v56 }
 0x3bb   :  { %v3423_v63 = vpop.eup %3422  ;;  %v1726_v58 = vmul.f32 %v1722_v0, %v1694_v4  ;;  %v3366_v0 = vld [vmem:[#allocation7 + $0x6a0] ss:$8 sps:$4 sm:$0xff]   ;;  %v3372_v4 = vld [vmem:[#allocation7 + $0x690] ss:$8 sps:$4 sm:$0xff]  }
 0x3bc   :  { %v1725_v3 = vadd.f32 1.0, %v3423_v63  ;;  %v1728_v5 = vmul.f32 %v1724_v40, %v1696_v51  ;;  %v3363_v40 = vld [vmem:[#allocation7 + $0x7b0] ss:$8 sps:$4 sm:$0xff]   ;;  %v3368_v63 = vld [vmem:[#allocation7 + $0x6a4] ss:$8 sps:$4 sm:$0xff]   ;;  %2254 = vmatpush2.bf16.msra.mxu0 %v3360_v60 }
 0x3bd   :  { %v3371_v51 = vld [vmem:[#allocation7 + $0x7a4] ss:$8 sps:$4 sm:$0xff]   ;;  %v3369_v2 = vld [vmem:[#allocation7 + $0x7a0] ss:$8 sps:$4 sm:$0xff]   ;;  %2255 = vmatprep.subr.bf16.mxu0 %v3368_v63 }
 0x3be   :  { %v1729_v9 = vmul.f32 %v1725_v3, %v1697_v62  ;;  %v1730_v27 = vpack.c.bf16 %v1728_v5, %v1726_v58  ;;  %v3374_v62 = vld [vmem:[#allocation7 + $0x694] ss:$8 sps:$4 sm:$0xff]   ;;  %v3375_v5 = vld [vmem:[#allocation7 + $0x790] ss:$8 sps:$4 sm:$0xff]   ;;  %v3378_v58 = vld [vmem:[#allocation7 + $0x680] ss:$8 sps:$4 sm:$0xff]  }
 0x3bf   :  { %v3377_v3 = vld [vmem:[#allocation7 + $0x794] ss:$8 sps:$4 sm:$0xff]  }
 0x3c0   :  { %v1731_v10 = vpack.c.bf16 %v1729_v9, %v1727_v8  ;;  %2256 = vmatpush2.bf16.msra.mxu0 %v3366_v0  ;;  %v3380_v8 = vld [vmem:[#allocation7 + $0x684] ss:$8 sps:$4 sm:$0xff]  }
 0x3c1   :  { %2257 = vmatprep.subr.bf16.mxu0 %v3374_v62  ;;  %v3383_v9 = vld [vmem:[#allocation7 + $0x784] ss:$8 sps:$4 sm:$0xff]  }
 0x3c2   :  { %1970 = vmatprep.mubr.bf16.mxu1 %v1731_v10  ;;  %v3381_v10 = vld [vmem:[#allocation7 + $0x780] ss:$8 sps:$4 sm:$0xff]  }
 0x3c3   :  { %1971 = vmatmul.mubr.bf16.vlgmr.msra.gmra.mxu1 %v1730_v27  ;;  %v436_v27 = vld [vmem:[#allocation9 + $0x2] sm:$0x3] }
 0x3c4   :  { %2485 = vmatpush1.bf16.msra.mxu1 %v3291_v37  ;;  %2258 = vmatpush2.bf16.msra.mxu0 %v3372_v4  ;;  %v2562_v37 = vld [vmem:[#allocation10 + $0xf8] sm:$0xff] }
 0x3c5   :  { %2486 = vmatprep.subr.bf16.mxu1 %v3299_v29  ;;  %2259 = vmatprep.subr.bf16.mxu0 %v3380_v8  ;;  %v441_v29 = vrot.slane %v436_v27, %v3785_v41 }
 0x3c8   :  { %2487 = vmatpush1.bf16.msra.mxu1 %v3297_v30  ;;  %2260 = vmatpush2.bf16.msra.mxu0 %v3378_v58  ;;  %v445_v30 = vrot.slane %v436_v27, %v3787_v43 }
 0x3c9   :  { %2488 = vmatprep.subr.bf16.mxu1 %v3305_v31  ;;  %2911 = vmatprep.subr.mxu0 %v2562_v37  ;;  %v3975_v31 = vadd.f32 %v3944_v61, %v441_v29  ;;  %v3994_v61 = vadd.f32 %v3956_v16, %v3961_v21  ;;  %v4008_v16 = vadd.f32 %v3958_v19, %v3964_v22 }
 0x3cb   :  { %v1242_v12 = vmul.f32 0.044715, %v4008_v16 }
 0x3cc   :  { %2489 = vmatpush1.bf16.msra.mxu1 %v3303_v32  ;;  %v3978_v32 = vadd.f32 %v3946_v6, %v445_v30 }
 0x3cd   :  { %2490 = vmatprep.subr.bf16.mxu1 %v3311_v33  ;;  %v3981_v33 = vadd.f32 %v3948_v7, %v441_v29  ;;  %v1246_v26 = vmul.f32 %v1242_v12, %v4008_v16 }
 0x3cf   :  { %v657_v6 = vmul.f32 0.044715, %v3981_v33 }
 0x3d0   :  { %2491 = vmatpush1.bf16.msra.mxu1 %v3309_v34  ;;  %v655_v34 = vmul.f32 0.044715, %v3975_v31 }
 0x3d1   :  { %2492 = vmatprep.subr.bf16.mxu1 %v3317_v35  ;;  %v3985_v35 = vadd.f32 %v3950_v14, %v445_v30  ;;  %v4001_v14 = vadd.f32 %v3954_v20, %v3964_v22  ;;  %v1766_v20 = vld [vmem:[#allocation9 + $0xa] sm:$0x3] }
 0x3d2   :  { %v659_v7 = vmul.f32 %v655_v34, %v3975_v31  ;;  %v1771_v22 = vrot.slane %v1766_v20, %v3785_v41 }
 0x3d3   :  { %v1240_v54 = vmul.f32 0.044715, %v4001_v14 }
 0x3d4   :  { %2493 = vmatpush1.bf16.msra.mxu1 %v3315_v36  ;;  %v3989_v36 = vadd.f32 %v3952_v18, %v3961_v21  ;;  %v661_v21 = vmul.f32 %v657_v6, %v3981_v33  ;;  %v663_v49 = vmul.f32 %v659_v7, %v3975_v31 }
 0x3d5   :  { %2494 = vmatprep.subr.bf16.mxu1 %v3323_v38  ;;  %v656_v38 = vmul.f32 0.044715, %v3978_v32 }
 0x3d6   :  { %v1239_v42 = vmul.f32 0.044715, %v3989_v36  ;;  %v665_v19 = vmul.f32 %v661_v21, %v3981_v33 }
 0x3d7   :  { %v660_v18 = vmul.f32 %v656_v38, %v3978_v32 }
 0x3d8   :  { %2495 = vmatpush1.bf16.msra.mxu1 %v3321_v39  ;;  %v658_v39 = vmul.f32 0.044715, %v3985_v35  ;;  %v669_v23 = vadd.f32 %v665_v19, %v3981_v33 }
 0x3d9   :  { %2496 = vmatprep.subr.bf16.mxu1 %v3329_v45  ;;  %v1241_v45 = vmul.f32 0.044715, %v3994_v61  ;;  %v664_v11 = vmul.f32 %v660_v18, %v3978_v32 }
 0x3db   :  { %v668_v17 = vadd.f32 %v664_v11, %v3978_v32 }
 0x3dc   :  { %2497 = vmatpush1.bf16.msra.mxu1 %v3327_v46  ;;  %v662_v46 = vmul.f32 %v658_v39, %v3985_v35 }
 0x3dd   :  { %2498 = vmatprep.subr.bf16.mxu1 %v3335_v1  ;;  %v1243_v1 = vmul.f32 %v1239_v42, %v3989_v36 }
 0x3de   :  { %v666_v13 = vmul.f32 %v662_v46, %v3985_v35 }
 0x3df   :  { %v1247_v52 = vmul.f32 %v1243_v1, %v3989_v36 }
 0x3e0   :  { %2499 = vmatpush1.bf16.msra.mxu1 %v3333_v44  ;;  %v1245_v44 = vmul.f32 %v1241_v45, %v3994_v61 }
 0x3e1   :  { %2500 = vmatprep.subr.bf16.mxu1 %v3341_v50  ;;  %v667_v50 = vadd.f32 %v663_v49, %v3975_v31  ;;  %v1251_v56 = vadd.f32 %v1247_v52, %v3989_v36 }
 0x3e3   :  { %v671_v53 = vmul.f32 0.7978846, %v667_v50  ;;  %v1255_v58 = vmul.f32 0.7978846, %v1251_v56  ;;  %v654_v56 = vmul.f32 0.5, %v3985_v35 }
 0x3e4   :  { %2501 = vmatpush2.bf16.msra.mxu1 %v3339_v15  ;;  %v1244_v15 = vmul.f32 %v1240_v54, %v4001_v14 }
 0x3e5   :  { %2502 = vmatprep.subr.bf16.mxu1 %v3347_v47  ;;  %v1775_v47 = vrot.slane %v1766_v20, %v3787_v43  ;;  %3424 = vtanh.f32 %v671_v53 }
 0x3e6   :  { %v1248_v25 = vmul.f32 %v1244_v15, %v4001_v14 }
 0x3e8   :  { %2503 = vmatpush2.bf16.msra.mxu1 %v3345_v59  ;;  %v1249_v59 = vmul.f32 %v1245_v44, %v3994_v61  ;;  %v1252_v8 = vadd.f32 %v1248_v25, %v4001_v14  ;;  %v653_v25 = vmul.f32 0.5, %v3981_v33 }
 0x3e9   :  { %2504 = vmatprep.subr.bf16.mxu1 %v3353_v28 }
 0x3ea   :  { %v1253_v63 = vadd.f32 %v1249_v59, %v3994_v61  ;;  %v1256_v39 = vmul.f32 0.7978846, %v1252_v8  ;;  %v1237_v8 = vmul.f32 0.5, %v3994_v61  ;;  %v1238_v61 = vmul.f32 0.5, %v4008_v16 }
 0x3ec   :  { %2505 = vmatpush2.bf16.msra.mxu1 %v3351_v48  ;;  %v1257_v29 = vmul.f32 0.7978846, %v1253_v63 }
 0x3ed   :  { %2506 = vmatprep.subr.bf16.mxu1 %v3359_v24  ;;  %v670_v24 = vadd.f32 %v666_v13, %v3985_v35 }
 0x3f0   :  { %2507 = vmatpush2.bf16.msra.mxu1 %v3357_v55 }
 0x3f1   :  { %2508 = vmatprep.subr.bf16.mxu1 %v3365_v57 }
 0x3f2   :  { %v3425_v19 = vpop.eup %3424 }
 0x3f4   :  { %2509 = vmatpush2.bf16.msra.mxu1 %v3363_v40  ;;  %v672_v40 = vmul.f32 0.7978846, %v668_v17 }
 0x3f5   :  { %2510 = vmatprep.subr.bf16.mxu1 %v3371_v51  ;;  %v1250_v51 = vmul.f32 %v1246_v26, %v4008_v16 }
 0x3f6   :  { %3426 = vtanh.f32 %v672_v40 }
 0x3f7   :  { %v1254_v30 = vadd.f32 %v1250_v51, %v4008_v16  ;;  %v2561_v16 = vld [vmem:[#allocation10 + $0xf0] sm:$0xff] }
 0x3f8   :  { %2511 = vmatpush2.bf16.msra.mxu1 %v3369_v2  ;;  %v673_v2 = vmul.f32 0.7978846, %v669_v23  ;;  %v651_v23 = vmul.f32 0.5, %v3975_v31 }
 0x3f9   :  { %2512 = vmatprep.subr.bf16.mxu1 %v3377_v3  ;;  %v1258_v49 = vmul.f32 0.7978846, %v1254_v30 }
 0x3fa   :  { %3428 = vtanh.f32 %v673_v2 }
 0x3fc   :  { %2513 = vmatpush2.bf16.msra.mxu1 %v3375_v5  ;;  %v674_v5 = vmul.f32 0.7978846, %v670_v24 }
 0x3fd   :  { %2514 = vmatprep.subr.bf16.mxu1 %v3383_v9 }
 0x3fe   :  { %3430 = vtanh.f32 %v674_v5 }
 0x3ff   :  { %3432 = vtanh.f32 %v1255_v58 }
 0x400   :  { %2515 = vmatpush2.bf16.msra.mxu1 %v3381_v10  ;;  %3434 = vtanh.f32 %v1257_v29 }
 0x401   :  { %2949 = vmatprep.subr.mxu1 %v2562_v37 }
 0x483   :  { %v1972_v28 = vpop.f32.mrf.mxu1 }
 0x484   :  { %v4029_v48 = vadd.f32 %v1972_v28, %v1771_v22 }
 0x485   :  { %v1974_v55 = vpop.f32.mrf.mxu1 }
 0x486   :  { %v1985_v57 = vmul.f32 0.044715, %v4029_v48  ;;  %v4035_v60 = vadd.f32 %v1974_v55, %v1775_v47  ;;  %v652_v55 = vmul.f32 0.5, %v3978_v32  ;;  %v1981_v40 = vmul.f32 0.5, %v4029_v48 }
 0x487   :  { %v1976_v0 = vpop.f32.mrf.mxu1 }
 0x488   :  { %v1989_v62 = vmul.f32 %v1985_v57, %v4029_v48  ;;  %v1986_v3 = vmul.f32 0.044715, %v4035_v60  ;;  %v4041_v4 = vadd.f32 %v1976_v0, %v1771_v22  ;;  %v3427_v22 = vpop.eup %3426  ;;  %v1982_v35 = vmul.f32 0.5, %v4035_v60 }
 0x489   :  { %v1978_v9 = vpop.f32.mrf.mxu1  ;;  %v3429_v50 = vpop.eup %3428  ;;  %v680_v59 = vadd.f32 1.0, %v3427_v22  ;;  %v2560_v22 = vld [vmem:[#allocation10 + $0xe8] sm:$0xff] }
 0x48a   :  { %v1993_v10 = vmul.f32 %v1989_v62, %v4029_v48  ;;  %v1990_v37 = vmul.f32 %v1986_v3, %v4035_v60  ;;  %v1987_v27 = vmul.f32 0.044715, %v4041_v4  ;;  %v4048_v34 = vadd.f32 %v1978_v9, %v1775_v47  ;;  %v3431_v13 = vpop.eup %3430 }
 0x48b   :  { %v3433_v15 = vpop.eup %3432  ;;  %v679_v47 = vadd.f32 1.0, %v3425_v19  ;;  %v681_v26 = vadd.f32 1.0, %v3429_v50  ;;  %v1235_v62 = vmul.f32 0.5, %v3989_v36  ;;  %v684_v3 = vmul.f32 %v680_v59, %v652_v55  ;;  %v2545_v19 = vld [vmem:[#allocation10 + $0x70] sm:$0xff]  ;;  %v2544_v50 = vld [vmem:[#allocation10 + $0x68] sm:$0xff] }
 0x48c   :  { %v1997_v38 = vadd.f32 %v1993_v10, %v4029_v48  ;;  %v1994_v6 = vmul.f32 %v1990_v37, %v4035_v60  ;;  %v1991_v7 = vmul.f32 %v1987_v27, %v4041_v4  ;;  %v1988_v42 = vmul.f32 0.044715, %v4048_v34  ;;  %v3435_v52 = vpop.eup %3434  ;;  %v2541_v59 = vld [vmem:[#allocation10 + $0x50] sm:$0xff] }
 0x48d   :  { %v683_v63 = vmul.f32 %v679_v47, %v651_v23  ;;  %v1263_v51 = vadd.f32 1.0, %v3433_v15  ;;  %v1265_v0 = vadd.f32 1.0, %v3435_v52  ;;  %v685_v31 = vmul.f32 %v681_v26, %v653_v25  ;;  %v2543_v15 = vld [vmem:[#allocation10 + $0x60] sm:$0xff]  ;;  %v2558_v52 = vld [vmem:[#allocation10 + $0xd8] sm:$0xff]  ;;  %v2556_v26 = vld [vmem:[#allocation10 + $0xc8] sm:$0xff] }
 0x48e   :  { %v2001_v18 = vmul.f32 0.7978846, %v1997_v38  ;;  %v1998_v45 = vadd.f32 %v1994_v6, %v4035_v60  ;;  %v1995_v21 = vmul.f32 %v1991_v7, %v4041_v4  ;;  %v1992_v46 = vmul.f32 %v1988_v42, %v4048_v34  ;;  %v2542_v47 = vld [vmem:[#allocation10 + $0x58] sm:$0xff]  ;;  %v2555_v23 = vld [vmem:[#allocation10 + $0xc0] sm:$0xff]  ;;  %v2553_v55 = vld [vmem:[#allocation10 + $0xb0] sm:$0xff] }
 0x48f   :  { %v1983_v33 = vmul.f32 0.5, %v4041_v4  ;;  %v682_v58 = vadd.f32 1.0, %v3431_v13  ;;  %v1236_v27 = vmul.f32 0.5, %v4001_v14  ;;  %v1267_v30 = vmul.f32 %v1263_v51, %v1235_v62  ;;  %v2559_v13 = vld [vmem:[#allocation10 + $0xe0] sm:$0xff]  ;;  %v2538_v25 = vld [vmem:[#allocation10 + $0x38] sm:$0xff]  ;;  %v2549_v62 = vld [vmem:[#allocation10 + $0x90] sm:$0xff] }
 0x490   :  { %3436 = vtanh.f32 %v2001_v18  ;;  %v2002_v54 = vmul.f32 0.7978846, %v1998_v45  ;;  %v1999_v20 = vadd.f32 %v1995_v21, %v4041_v4  ;;  %v1996_v1 = vmul.f32 %v1992_v46, %v4048_v34  ;;  %v2535_v51 = vld [vmem:[#allocation10 + $0x20] sm:$0xff] }
 0x491   :  { %3438 = vtanh.f32 %v1256_v39  ;;  %v1269_v36 = vmul.f32 %v1265_v0, %v1237_v8  ;;  %v1984_v38 = vmul.f32 0.5, %v4048_v34  ;;  %v686_v45 = vmul.f32 %v682_v58, %v654_v56  ;;  %v2537_v56 = vld [vmem:[#allocation10 + $0x30] sm:$0xff]  ;;  %v2550_v0 = vld [vmem:[#allocation10 + $0x98] sm:$0xff]  ;;  %v2547_v8 = vld [vmem:[#allocation10 + $0x80] sm:$0xff] }
 0x492   :  { %v2003_v11 = vmul.f32 0.7978846, %v1999_v20  ;;  %3440 = vtanh.f32 %v2002_v54  ;;  %v2000_v44 = vadd.f32 %v1996_v1, %v4048_v34 }
 0x493   :  { %3442 = vtanh.f32 %v1258_v49 }
 0x494   :  { %3444 = vtanh.f32 %v2003_v11  ;;  %v2004_v12 = vmul.f32 0.7978846, %v2000_v44 }
 0x496   :  { %3446 = vtanh.f32 %v2004_v12  ;;  %v2546_v12 = vld [vmem:[#allocation10 + $0x78] sm:$0xff] }
 0x49d   :  { %v3437_v17 = vpop.eup %3436 }
 0x49e   :  { %v3439_v28 = vpop.eup %3438  ;;  %v2009_v53 = vadd.f32 1.0, %v3437_v17  ;;  %v2557_v17 = vld [vmem:[#allocation10 + $0xd0] sm:$0xff] }
 0x49f   :  { %v3441_v24 = vpop.eup %3440  ;;  %v1264_v10 = vadd.f32 1.0, %v3439_v28  ;;  %v2540_v28 = vld [vmem:[#allocation10 + $0x48] sm:$0xff] }
 0x4a0   :  { %v3443_v57 = vpop.eup %3442  ;;  %v2010_v5 = vadd.f32 1.0, %v3441_v24  ;;  %v2013_v32 = vmul.f32 %v2009_v53, %v1981_v40  ;;  %v2539_v53 = vld [vmem:[#allocation10 + $0x40] sm:$0xff]  ;;  %v2554_v24 = vld [vmem:[#allocation10 + $0xb8] sm:$0xff]  ;;  %v2536_v40 = vld [vmem:[#allocation10 + $0x28] sm:$0xff] }
 0x4a1   :  { %v3445_v2 = vpop.eup %3444  ;;  %v1266_v48 = vadd.f32 1.0, %v3443_v57  ;;  %v1268_v21 = vmul.f32 %v1264_v10, %v1236_v27  ;;  %v2552_v57 = vld [vmem:[#allocation10 + $0xa8] sm:$0xff] }
 0x4a2   :  { %v2011_v9 = vadd.f32 1.0, %v3445_v2  ;;  %v2014_v7 = vmul.f32 %v2010_v5, %v1982_v35  ;;  %v2017_v4 = vmul.f32 %v2013_v32, %v683_v63  ;;  %v2272_v42 = vmul.f32 %v2013_v32, %v1267_v30  ;;  %v2551_v63 = vld [vmem:[#allocation10 + $0xa0] sm:$0xff]  ;;  %v2534_v2 = vld [vmem:[#allocation10 + $0x18] sm:$0xff]  ;;  %v2548_v5 = vld [vmem:[#allocation10 + $0x88] sm:$0xff] }
 0x4a3   :  { %v3447_v37 = vpop.eup %3446  ;;  %v1270_v49 = vmul.f32 %v1266_v48, %v1238_v61  ;;  %v2312_v32 = vld [vmem:[#allocation9 + $0xe] sm:$0x3] }
 0x4a4   :  { %v2015_v29 = vmul.f32 %v2011_v9, %v1983_v33  ;;  %v2012_v6 = vadd.f32 1.0, %v3447_v37  ;;  %v2018_v14 = vmul.f32 %v2014_v7, %v684_v3  ;;  %v2273_v1 = vmul.f32 %v2014_v7, %v1268_v21  ;;  %v2533_v3 = vld [vmem:[#allocation10 + $0x10] sm:$0xff]  ;;  %v2531_v33 = vld [vmem:[#allocation10] sm:$0xff]  ;;  %v2057_v9 = vld [vmem:[#allocation9 + $0xc] sm:$0x3] }
 0x4a5   :  { %v2062_v58 = vrot.slane %v2057_v9, %v3785_v41  ;;  %v2317_v35 = vrot.slane %v2312_v32, %v3785_v41  ;;  %v2066_v10 = vrot.slane %v2057_v9, %v3787_v43  ;;  %v2321_v48 = vrot.slane %v2312_v32, %v3787_v43 }
 0x4a6   :  { %v2019_v39 = vmul.f32 %v2015_v29, %v685_v31  ;;  %v2274_v18 = vmul.f32 %v2015_v29, %v1269_v36  ;;  %v2016_v60 = vmul.f32 %v2012_v6, %v1984_v38  ;;  %v2532_v31 = vld [vmem:[#allocation10 + $0x8] sm:$0xff] }
 0x4a8   :  { %v2021_v46 = vpack.c.bf16 %v2019_v39, %v2017_v4  ;;  %v2276_v54 = vpack.c.bf16 %v2274_v18, %v2272_v42  ;;  %v2020_v20 = vmul.f32 %v2016_v60, %v686_v45  ;;  %v2275_v11 = vmul.f32 %v2016_v60, %v1270_v49 }
 0x4aa   :  { %v2022_v44 = vpack.c.bf16 %v2020_v20, %v2018_v14  ;;  %v2277_v34 = vpack.c.bf16 %v2275_v11, %v2273_v1 }
 0x4ac   :  { %2261 = vmatprep.mubr.bf16.mxu0 %v2022_v44  ;;  %2516 = vmatprep.mubr.bf16.mxu1 %v2277_v34 }
 0x4ad   :  { %2262 = vmatmul.mubr.bf16.vlgmr.msra.gmra.mxu0 %v2021_v46  ;;  %2517 = vmatmul.mubr.bf16.vlgmr.msra.gmra.mxu1 %v2276_v54 }
 0x4ae   :  { %2912 = vmatpush3.msra.mxu0 %v2546_v12  ;;  %2965 = vmatpush3.msra.mxu1 %v2546_v12 }
 0x4af   :  { %2913 = vmatprep.subr.mxu0 %v2561_v16  ;;  %2950 = vmatprep.subr.mxu1 %v2561_v16 }
 0x4b0   :  { %2914 = vmatpush3.msra.mxu0 %v2545_v19  ;;  %2966 = vmatpush3.msra.mxu1 %v2545_v19 }
 0x4b1   :  { %2915 = vmatprep.subr.mxu0 %v2560_v22  ;;  %2951 = vmatprep.subr.mxu1 %v2560_v22 }
 0x4b2   :  { %2916 = vmatpush3.msra.mxu0 %v2544_v50  ;;  %2967 = vmatpush3.msra.mxu1 %v2544_v50 }
 0x4b3   :  { %2917 = vmatprep.subr.mxu0 %v2559_v13  ;;  %2952 = vmatprep.subr.mxu1 %v2559_v13 }
 0x4b4   :  { %2918 = vmatpush3.msra.mxu0 %v2543_v15  ;;  %2968 = vmatpush3.msra.mxu1 %v2543_v15 }
 0x4b5   :  { %2919 = vmatprep.subr.mxu0 %v2558_v52  ;;  %2953 = vmatprep.subr.mxu1 %v2558_v52 }
 0x4b6   :  { %2920 = vmatpush3.msra.mxu0 %v2542_v47  ;;  %2969 = vmatpush3.msra.mxu1 %v2542_v47 }
 0x4b7   :  { %2921 = vmatprep.subr.mxu0 %v2557_v17  ;;  %2954 = vmatprep.subr.mxu1 %v2557_v17 }
 0x4b8   :  { %2922 = vmatpush3.msra.mxu0 %v2541_v59  ;;  %2970 = vmatpush3.msra.mxu1 %v2541_v59 }
 0x4b9   :  { %2923 = vmatprep.subr.mxu0 %v2556_v26  ;;  %2955 = vmatprep.subr.mxu1 %v2556_v26 }
 0x4ba   :  { %2924 = vmatpush3.msra.mxu0 %v2540_v28  ;;  %2971 = vmatpush3.msra.mxu1 %v2540_v28 }
 0x4bb   :  { %2925 = vmatprep.subr.mxu0 %v2555_v23  ;;  %2956 = vmatprep.subr.mxu1 %v2555_v23 }
 0x4bc   :  { %2926 = vmatpush3.msra.mxu0 %v2539_v53  ;;  %2972 = vmatpush3.msra.mxu1 %v2539_v53 }
 0x4bd   :  { %2927 = vmatprep.subr.mxu0 %v2554_v24  ;;  %2957 = vmatprep.subr.mxu1 %v2554_v24 }
 0x4be   :  { %2928 = vmatpush3.msra.mxu0 %v2538_v25  ;;  %2973 = vmatpush3.msra.mxu1 %v2538_v25 }
 0x4bf   :  { %2929 = vmatprep.subr.mxu0 %v2553_v55  ;;  %2958 = vmatprep.subr.mxu1 %v2553_v55 }
 0x4c0   :  { %2930 = vmatpush3.msra.mxu0 %v2537_v56  ;;  %2974 = vmatpush3.msra.mxu1 %v2537_v56 }
 0x4c1   :  { %2931 = vmatprep.subr.mxu0 %v2552_v57  ;;  %2959 = vmatprep.subr.mxu1 %v2552_v57 }
 0x4c2   :  { %2932 = vmatpush3.msra.mxu0 %v2536_v40  ;;  %2975 = vmatpush3.msra.mxu1 %v2536_v40 }
 0x4c3   :  { %2933 = vmatprep.subr.mxu0 %v2551_v63  ;;  %2960 = vmatprep.subr.mxu1 %v2551_v63 }
 0x4c4   :  { %2934 = vmatpush3.msra.mxu0 %v2535_v51  ;;  %2976 = vmatpush3.msra.mxu1 %v2535_v51 }
 0x4c5   :  { %2935 = vmatprep.subr.mxu0 %v2550_v0  ;;  %2961 = vmatprep.subr.mxu1 %v2550_v0 }
 0x4c6   :  { %2936 = vmatpush3.msra.mxu0 %v2534_v2  ;;  %2977 = vmatpush3.msra.mxu1 %v2534_v2 }
 0x4c7   :  { %2937 = vmatprep.subr.mxu0 %v2549_v62  ;;  %2962 = vmatprep.subr.mxu1 %v2549_v62 }
 0x4c8   :  { %2938 = vmatpush3.msra.mxu0 %v2533_v3  ;;  %2978 = vmatpush3.msra.mxu1 %v2533_v3 }
 0x4c9   :  { %2939 = vmatprep.subr.mxu0 %v2548_v5  ;;  %2963 = vmatprep.subr.mxu1 %v2548_v5 }
 0x4ca   :  { %2940 = vmatpush3.msra.mxu0 %v2532_v31  ;;  %2979 = vmatpush3.msra.mxu1 %v2532_v31 }
 0x4cb   :  { %2941 = vmatprep.subr.mxu0 %v2547_v8  ;;  %2964 = vmatprep.subr.mxu1 %v2547_v8 }
 0x4cc   :  { %2942 = vmatpush3.msra.mxu0 %v2531_v33  ;;  %2980 = vmatpush3.msra.mxu1 %v2531_v33 }
 0x56d   :  { %v2263_v37 = vpop.f32.mrf.mxu0  ;;  %v2518_v27 = vpop.f32.mrf.mxu1 }
 0x56e   :  { %v2264_v29 = vadd.f32 %v2263_v37, %v2062_v58  ;;  %v2519_v30 = vadd.f32 %v2518_v27, %v2317_v35 }
 0x56f   :  { %v2265_v36 = vpop.f32.mrf.mxu0  ;;  %v2520_v38 = vpop.f32.mrf.mxu1 }
 0x570   :  { %v2266_v6 = vadd.f32 %v2265_v36, %v2066_v10  ;;  %v2521_v7 = vadd.f32 %v2520_v38, %v2321_v48  ;;  %v2527_v42 = vmul.f32 %v2519_v30, %v2264_v29 }
 0x571   :  { %v2267_v61 = vpop.f32.mrf.mxu0  ;;  %v2522_v4 = vpop.f32.mrf.mxu1 }
 0x572   :  { %v2528_v39 = vmul.f32 %v2521_v7, %v2266_v6  ;;  %v2268_v18 = vadd.f32 %v2267_v61, %v2062_v58  ;;  %v2523_v45 = vadd.f32 %v2522_v4, %v2317_v35 }
 0x573   :  { %v2269_v60 = vpop.f32.mrf.mxu0  ;;  %v2524_v41 = vpop.f32.mrf.mxu1 }
 0x574   :  { %v2270_v21 = vadd.f32 %v2269_v60, %v2066_v10  ;;  %v2525_v49 = vadd.f32 %v2524_v41, %v2321_v48  ;;  %2627 = vmatprep.mubr.f32.mxu0 %v2528_v39  ;;  %v2529_v46 = vmul.f32 %v2523_v45, %v2268_v18 }
 0x575   :  { %2628 = vmatmul.mubr.f32.vlgmr.msra.gmra.mxu0 %v2527_v42 }
 0x576   :  { %v2530_v43 = vmul.f32 %v2525_v49, %v2270_v21 }
 0x578   :  { %2632 = vmatprep.mubr.f32.mxu1 %v2530_v43 }
 0x579   :  { %2633 = vmatmul.mubr.f32.vlgmr.msra.gmra.mxu1 %v2529_v46 }
 0x635   :  { %v2943_v54 = vpop.f32.mrf.mxu0 }
 0x637   :  { %v2944_v14 = vpop.f32.mrf.mxu0 }
 0x638   :  { %v2945_v20 = vadd.f32 %v2944_v14, %v2943_v54 }
 0x639   :  { %v2946_v1 = vpop.f32.mrf.mxu1 }
 0x63a   :  { %2639 = vst.msk [vmem:[%s4088_s6] sm:$0xff] %vm2638_vm0, %v2945_v20 }
 0x63b   :  { %v2947_v11 = vpop.f32.mrf.mxu1 }
 0x63c   :  { %v2948_v44 = vadd.f32 %v2947_v11, %v2946_v1 }
 0x63e   :  { %2640 = vst.msk [vmem:[%s4088_s6 + $0x8] sm:$0xff] %vm2638_vm0, %v2948_v44 }
 0x63f   :  { %2645 = vsyncpa [#allocation3], 1 }
 0x640   :  { %2646 = vsyncpa [#allocation5], 1 }
 0x641   :  { %2647 = vsyncpa [#allocation8], 1 }
 0x642   :  { %2648 = vsyncpa [#allocation11], 1 }

</bundles_post_ra>
